<compile_context>
chip_gen: v7x
topology: tpu7x:2x2x1
jax: 0.10.0
libtpu: 0.0.40
codegen_flags: <defaults>
</compile_context>

<pallas_src>
import functools

import jax
import jax.numpy as jnp
from jax.experimental import pallas as pl
from jax.experimental.pallas import tpu as pltpu

_GELU_C0 = 0.7978845608028654   # sqrt(2/pi)
_GELU_C1 = 0.044715


def _gelu(x):
    # tanh-approximate GELU: the transcendental runs on the EUP slot.
    u = _GELU_C0 * (x + _GELU_C1 * x * x * x)
    return 0.5 * x * (1.0 + jnp.tanh(u))


def _layer_norm(x, gamma, beta, eps=1e-5):
    mu = jnp.mean(x, axis=-1, keepdims=True)
    xc = x - mu
    var = jnp.mean(xc * xc, axis=-1, keepdims=True)
    return xc * jax.lax.rsqrt(var + eps) * gamma + beta


def _dot(x, w):
    return jnp.dot(x, w, preferred_element_type=jnp.float32)


def _gather_rows(table, idx_col, chunk):
    """Row gather via chunked one-hot matmuls on the MXU.

    table:   [Lp, H] bf16 node table (resident in VMEM)
    idx_col: [R, 1] int32 row indices (0..Lp-1)
    returns: [R, H] f32 gathered rows.
    """
    R = idx_col.shape[0]
    Lp = table.shape[0]
    outs = []
    for r0 in range(0, R, chunk):
        r1 = min(r0 + chunk, R)
        sub = idx_col[r0:r1]                                          # [c, 1]
        iota = jax.lax.broadcasted_iota(jnp.int32, (r1 - r0, Lp), 1)  # [c, Lp]
        onehot = (iota == sub).astype(table.dtype)                    # lane bcast
        outs.append(jnp.dot(onehot, table, preferred_element_type=jnp.float32))
    return outs[0] if len(outs) == 1 else jnp.concatenate(outs, axis=0)


# ----------------------------------------------------------------------------
# Kernel 1: node update  (W1/W2/W3 message MLP, neighbor-sum, norm1, FFN, norm2)
# ----------------------------------------------------------------------------
def _node_update_kernel(K, TL, H, Lp, scale, gchunk,
                        hVt_ref, hVf_ref, hE_ref, idx_ref, mA_ref, mV_ref,
                        W1s_ref, W1e_ref, W1g_ref, b1_ref,
                        W2_ref, b2_ref, W3_ref, b3_ref,
                        g1_ref, be1_ref,
                        Win_ref, bin_ref, Wout_ref, bout_ref,
                        g2_ref, be2_ref,
                        out_ref):
    f32, bf16 = jnp.float32, jnp.bfloat16

    hV = hVt_ref[0]                                   # [TL, H] f32 (this tile)
    hV_table = hVf_ref[0].astype(bf16)                # [Lp, H] bf16 (gather table)
    hE = hE_ref[0].reshape(TL * K, H)                 # [TL*K, H] f32
    idx_col = idx_ref[0].reshape(TL * K, 1)           # [TL*K, 1] int32
    mA = mA_ref[0].astype(f32)                        # [TL, K, 1]
    mV = mV_ref[0]                                    # [TL, 1]

    # In-VMEM neighbor gather (replaces the HBM torch.gather round trip).
    hVg = _gather_rows(hV_table, idx_col, gchunk)     # [TL*K, H] f32

    # W1 acts on concat([h_V_expand, h_E, gathered h_V], -1).  The h_V_expand
    # contribution is k-independent -> computed once per node and broadcast
    # over the K neighbors (sublane broadcast).
    x_self = _dot(hV.astype(bf16), W1s_ref[...]) + b1_ref[...]              # [TL, H]
    x = _dot(hE.astype(bf16), W1e_ref[...]) + _dot(hVg.astype(bf16), W1g_ref[...])
    x = (x.reshape(TL, K, H) + x_self[:, None, :]).reshape(TL * K, H)

    h = _gelu(x)
    h = _gelu(_dot(h.astype(bf16), W2_ref[...]) + b2_ref[...])
    msg = _dot(h.astype(bf16), W3_ref[...]) + b3_ref[...]                   # [TL*K, H]

    # mask_attend then a single reduction over the neighbor (sublane) axis.
    dh = jnp.sum(msg.reshape(TL, K, H) * mA, axis=1) * (1.0 / scale)        # [TL, H]

    # dropout1 / dropout2 are identity in eval mode.
    hv1 = _layer_norm(hV + dh, g1_ref[...], be1_ref[...])
    ff = _gelu(_dot(hv1.astype(bf16), Win_ref[...]) + bin_ref[...])
    dh2 = _dot(ff.astype(bf16), Wout_ref[...]) + bout_ref[...]
    hv2 = _layer_norm(hv1 + dh2, g2_ref[...], be2_ref[...])
    out_ref[0] = (mV * hv2).astype(out_ref.dtype)


# ----------------------------------------------------------------------------
# Kernel 2: edge update  (W11/W12/W13 message MLP + norm3 residual)
# ----------------------------------------------------------------------------
def _edge_update_kernel(K, TL, H, Lp, gchunk,
                        hVt_ref, hVf_ref, hE_ref, idx_ref,
                        W11s_ref, W11e_ref, W11g_ref, b11_ref,
                        W12_ref, b12_ref, W13_ref, b13_ref,
                        g3_ref, be3_ref,
                        out_ref):
    f32, bf16 = jnp.float32, jnp.bfloat16

    hV = hVt_ref[0]                                   # [TL, H] f32 (updated, masked)
    hV_table = hVf_ref[0].astype(bf16)                # [Lp, H] bf16
    hE3 = hE_ref[0]                                   # [TL, K, H] f32 (original h_E)
    hE = hE3.reshape(TL * K, H)
    idx_col = idx_ref[0].reshape(TL * K, 1)           # [TL*K, 1] int32

    hVg = _gather_rows(hV_table, idx_col, gchunk)     # [TL*K, H] f32

    x_self = _dot(hV.astype(bf16), W11s_ref[...]) + b11_ref[...]            # [TL, H]
    x = _dot(hE.astype(bf16), W11e_ref[...]) + _dot(hVg.astype(bf16), W11g_ref[...])
    x = (x.reshape(TL, K, H) + x_self[:, None, :]).reshape(TL * K, H)

    h = _gelu(x)
    h = _gelu(_dot(h.astype(bf16), W12_ref[...]) + b12_ref[...])
    msg = _dot(h.astype(bf16), W13_ref[...]) + b13_ref[...]                 # [TL*K, H]

    # dropout3 identity; residual uses the f32 h_E block (no bf16 rounding on
    # the residual path); output is written directly in [L, K, H] layout.
    out = _layer_norm(hE3 + msg.reshape(TL, K, H), g3_ref[...], be3_ref[...])
    out_ref[0] = out.astype(out_ref.dtype)


# ----------------------------------------------------------------------------
# Wrapper (only E_idx/mask reshapes + L padding stay in plain JAX)
# ----------------------------------------------------------------------------
def _round_up(x, m):
    return ((x + m - 1) // m) * m


def _vmem_capacity_bytes():
    try:
        info = pltpu.get_tpu_info()
        cap = getattr(info, "vmem_capacity_bytes", None)
        if cap:
            return int(cap)
    except Exception:
        pass
    return 64 * 1024 * 1024   # conservative (v7x-sized) fallback


def _tiling_for_chip():
    cap = _vmem_capacity_bytes()
    if cap >= 100 * 1024 * 1024:                      # v5e / v6e (128 MiB VMEM)
        return 256, 96 * 1024 * 1024
    # v7x (64 MiB) or unknown: leave headroom for Mosaic internal scratch.
    return 128, min(48 * 1024 * 1024, (cap * 3) // 4)


def _gather_chunk_rows(R, Lp, target_bytes=4 * 1024 * 1024):
    rows = target_bytes // max(1, 2 * Lp)             # bf16 one-hot chunk
    rows = max(8, (rows // 8) * 8)
    return int(min(R, rows))


def enc_layer_forward(params, h_V, h_E, E_idx, mask_V=None, mask_attend=None,
                      scale=30.0, tile_l=None):
    f32, bf16 = jnp.float32, jnp.bfloat16
    h_V = h_V.astype(f32)
    h_E = h_E.astype(f32)
    B, L, H = h_V.shape
    K = E_idx.shape[-1]

    max_tile, vmem_limit = _tiling_for_chip()
    if tile_l is None:
        tile_l = min(max_tile, _round_up(L, 8))
    tile_l = max(8, min(_round_up(int(tile_l), 8), _round_up(L, 8)))
    Lp = _round_up(L, tile_l)
    n_lt = Lp // tile_l

    if mask_V is None:
        mask_V = jnp.ones((B, L), f32)
    if mask_attend is None:
        mask_attend = jnp.ones((B, L, K), f32)

    pad = Lp - L
    if pad:
        # Pad rows are fully masked (mask_V / mask_attend = 0, E_idx = 0) and
        # sliced off the outputs below.
        h_V = jnp.pad(h_V, ((0, 0), (0, pad), (0, 0)))
        h_E = jnp.pad(h_E, ((0, 0), (0, pad), (0, 0), (0, 0)))
        E_idx = jnp.pad(E_idx, ((0, 0), (0, pad), (0, 0)))
        mask_V = jnp.pad(mask_V, ((0, 0), (0, pad)))
        mask_attend = jnp.pad(mask_attend, ((0, 0), (0, pad), (0, 0)))

    idx4 = E_idx.astype(jnp.int32)[..., None]          # [B, Lp, K, 1]
    mA4 = mask_attend.astype(bf16)[..., None]          # [B, Lp, K, 1] (0/1 exact)
    mV3 = mask_V.astype(f32)[..., None]                # [B, Lp, 1]

    p = params
    wb = lambda name: p[name].astype(bf16)
    W1_t = p['W1_t'].astype(bf16)
    W1s, W1e, W1g = W1_t[:H], W1_t[H:2 * H], W1_t[2 * H:]
    W11_t = p['W11_t'].astype(bf16)
    W11s, W11e, W11g = W11_t[:H], W11_t[H:2 * H], W11_t[2 * H:]

    gchunk = _gather_chunk_rows(tile_l * K, Lp)

    # BlockSpecs: grid cell (batch b, L-tile t) -> one L-tile + its K neighbors,
    # plus the full per-batch node table (resident across L-tiles).
    node_tile = pl.BlockSpec((1, tile_l, H), lambda i, j: (i, j, 0))
    node_full = pl.BlockSpec((1, Lp, H), lambda i, j: (i, 0, 0))
    edge_blk = pl.BlockSpec((1, tile_l, K, H), lambda i, j: (i, j, 0, 0))
    kq_blk = pl.BlockSpec((1, tile_l, K, 1), lambda i, j: (i, j, 0, 0))
    mV_blk = pl.BlockSpec((1, tile_l, 1), lambda i, j: (i, j, 0))
    wspec = lambda a: pl.BlockSpec(a.shape, lambda i, j: (0,) * a.ndim)

    cparams = pltpu.CompilerParams(
        dimension_semantics=("parallel", "parallel"),
        vmem_limit_bytes=int(vmem_limit))

    # ---------------- node update ----------------
    node_w = [W1s, W1e, W1g, p['b1'], wb('W2_t'), p['b2'], wb('W3_t'), p['b3'],
              p['ln1_g'], p['ln1_b'],
              wb('Win_t'), p['bin'], wb('Wout_t'), p['bout'],
              p['ln2_g'], p['ln2_b']]
    node_in = [h_V, h_V, h_E, idx4, mA4, mV3] + node_w
    node_specs = ([node_tile, node_full, edge_blk, kq_blk, kq_blk, mV_blk]
                  + [wspec(a) for a in node_w])

    node_cost = pl.CostEstimate(
        flops=int(8 * B * K * Lp * H * H + 2 * B * K * Lp * Lp * H
                  + 20 * B * Lp * H * H),
        transcendentals=int(2 * B * K * Lp * H + 5 * B * Lp * H),
        bytes_accessed=int(4 * B * Lp * K * H + 12 * B * Lp * H + 8 * B * Lp * K))

    h_V_new = pl.pallas_call(
        functools.partial(_node_update_kernel, K, tile_l, H, Lp, float(scale),
                          gchunk),
        grid=(B, n_lt),
        in_specs=node_specs,
        out_specs=node_tile,
        out_shape=jax.ShapeDtypeStruct((B, Lp, H), f32),
        compiler_params=cparams,
        cost_estimate=node_cost,
    )(*node_in)

    # ------------- edge update (uses the updated, masked node features) -------
    edge_w = [W11s, W11e, W11g, p['b11'], wb('W12_t'), p['b12'],
              wb('W13_t'), p['b13'], p['ln3_g'], p['ln3_b']]
    edge_in = [h_V_new, h_V_new, h_E, idx4] + edge_w
    edge_specs = ([node_tile, node_full, edge_blk, kq_blk]
                  + [wspec(a) for a in edge_w])

    edge_cost = pl.CostEstimate(
        flops=int(8 * B * K * Lp * H * H + 2 * B * K * Lp * Lp * H
                  + 2 * B * Lp * H * H),
        transcendentals=int(2 * B * K * Lp * H),
        bytes_accessed=int(8 * B * Lp * K * H + 8 * B * Lp * H + 4 * B * Lp * K))

    h_E_new = pl.pallas_call(
        functools.partial(_edge_update_kernel, K, tile_l, H, Lp, gchunk),
        grid=(B, n_lt),
        in_specs=edge_specs,
        out_specs=edge_blk,
        out_shape=jax.ShapeDtypeStruct((B, Lp, K, H), f32),
        compiler_params=cparams,
        cost_estimate=edge_cost,
    )(*edge_in)

    if pad:
        h_V_new = h_V_new[:, :L]
        h_E_new = h_E_new[:, :L]
    return h_V_new, h_E_new


def init_params(key, H):
    # deterministic synthetic init; shapes follow EncLayer.__init__ with
    # num_hidden = H, num_in = 2*H (h_E has H channels -> cat gives 2H).
    num_in = 2 * H

    def lin(k, fan_in, fan_out):
        k1, k2 = jax.random.split(k)
        w_t = jax.random.normal(k1, (fan_in, fan_out), jnp.float32) / jnp.sqrt(float(fan_in))
        b = 0.1 * jax.random.normal(k2, (1, fan_out), jnp.float32)
        return w_t, b

    keys = jax.random.split(key, 8)
    p = {}
    p['W1_t'], p['b1'] = lin(keys[0], H + num_in, H)
    p['W2_t'], p['b2'] = lin(keys[1], H, H)
    p['W3_t'], p['b3'] = lin(keys[2], H, H)
    p['W11_t'], p['b11'] = lin(keys[3], H + num_in, H)
    p['W12_t'], p['b12'] = lin(keys[4], H, H)
    p['W13_t'], p['b13'] = lin(keys[5], H, H)
    p['Win_t'], p['bin'] = lin(keys[6], H, 4 * H)       # PositionWiseFeedForward.W_in
    p['Wout_t'], p['bout'] = lin(keys[7], 4 * H, H)     # PositionWiseFeedForward.W_out
    for i in (1, 2, 3):
        p[f'ln{i}_g'] = jnp.ones((1, H), jnp.float32)   # LayerNorm default init
        p[f'ln{i}_b'] = jnp.zeros((1, H), jnp.float32)
    return p


if __name__ == "__main__":
    # Small deterministic example; tile_l=8 with L=20 exercises multiple L-tiles
    # per batch plus the masked L-padding path (Lp = 24).
    B, L, K, H = 2, 20, 8, 128
    key = jax.random.PRNGKey(0)
    k1, k2, k3, k4, k5, kp = jax.random.split(key, 6)
    h_V = jax.random.normal(k1, (B, L, H), jnp.float32)
    h_E = jax.random.normal(k2, (B, L, K, H), jnp.float32)
    E_idx = jax.random.randint(k3, (B, L, K), 0, L, dtype=jnp.int32)
    mask_V = (jax.random.uniform(k4, (B, L)) > 0.2).astype(jnp.float32)
    mask_attend = (jax.random.uniform(k5, (B, L, K)) > 0.2).astype(jnp.float32)
    params = init_params(kp, H)

    h_V_new, h_E_new = enc_layer_forward(params, h_V, h_E, E_idx,
                                         mask_V, mask_attend, scale=30.0,
                                         tile_l=8)
    jax.block_until_ready((h_V_new, h_E_new))
    assert h_V_new.shape == (B, L, H)
    assert h_E_new.shape == (B, L, K, H)
    assert bool(jnp.isfinite(h_V_new).all()) and bool(jnp.isfinite(h_E_new).all())
    print("KERNEL_OK")
</pallas_src>

<mosaic_0001>
module attributes {stable_mosaic.version = 11 : i64} {
  func.func @_node_update_kernel(%arg0: i32, %arg1: i32, %arg2: memref<1x8x128xf32, #tpu.memory_space<vmem>>, %arg3: memref<1x24x128xf32, #tpu.memory_space<vmem>>, %arg4: memref<1x8x8x128xf32, #tpu.memory_space<vmem>>, %arg5: memref<1x8x8x1xi32, #tpu.memory_space<vmem>>, %arg6: memref<1x8x8x1xbf16, #tpu.memory_space<vmem>>, %arg7: memref<1x8x1xf32, #tpu.memory_space<vmem>>, %arg8: memref<128x128xbf16, #tpu.memory_space<vmem>>, %arg9: memref<128x128xbf16, #tpu.memory_space<vmem>>, %arg10: memref<128x128xbf16, #tpu.memory_space<vmem>>, %arg11: memref<1x128xf32, #tpu.memory_space<vmem>>, %arg12: memref<128x128xbf16, #tpu.memory_space<vmem>>, %arg13: memref<1x128xf32, #tpu.memory_space<vmem>>, %arg14: memref<128x128xbf16, #tpu.memory_space<vmem>>, %arg15: memref<1x128xf32, #tpu.memory_space<vmem>>, %arg16: memref<1x128xf32, #tpu.memory_space<vmem>>, %arg17: memref<1x128xf32, #tpu.memory_space<vmem>>, %arg18: memref<128x512xbf16, #tpu.memory_space<vmem>>, %arg19: memref<1x512xf32, #tpu.memory_space<vmem>>, %arg20: memref<512x128xbf16, #tpu.memory_space<vmem>>, %arg21: memref<1x128xf32, #tpu.memory_space<vmem>>, %arg22: memref<1x128xf32, #tpu.memory_space<vmem>>, %arg23: memref<1x128xf32, #tpu.memory_space<vmem>>, %arg24: memref<1x8x128xf32, #tpu.memory_space<vmem>>) attributes {dimension_semantics = [#tpu.dimension_semantics<parallel>, #tpu.dimension_semantics<parallel>], iteration_bounds = array<i64: 2, 3>, scalar_prefetch = 0 : i64, scratch_operands = 0 : i64, tpu.core_type = #tpu.core_type<tc>, window_params = [{transform_indices = @transform_0, window_bounds = array<i64: 1, 8, 128>}, {transform_indices = @transform_1, window_bounds = array<i64: 1, 24, 128>}, {transform_indices = @transform_2, window_bounds = array<i64: 1, 8, 8, 128>}, {transform_indices = @transform_3, window_bounds = array<i64: 1, 8, 8, 1>}, {transform_indices = @transform_4, window_bounds = array<i64: 1, 8, 8, 1>}, {transform_indices = @transform_5, window_bounds = array<i64: 1, 8, 1>}, {pipeline_mode = #tpu.pipeline_mode<synchronous>, transform_indices = @transform_6, window_bounds = array<i64: 128, 128>}, {pipeline_mode = #tpu.pipeline_mode<synchronous>, transform_indices = @transform_7, window_bounds = array<i64: 128, 128>}, {pipeline_mode = #tpu.pipeline_mode<synchronous>, transform_indices = @transform_8, window_bounds = array<i64: 128, 128>}, {pipeline_mode = #tpu.pipeline_mode<synchronous>, transform_indices = @transform_9, window_bounds = array<i64: 1, 128>}, {pipeline_mode = #tpu.pipeline_mode<synchronous>, transform_indices = @transform_10, window_bounds = array<i64: 128, 128>}, {pipeline_mode = #tpu.pipeline_mode<synchronous>, transform_indices = @transform_11, window_bounds = array<i64: 1, 128>}, {pipeline_mode = #tpu.pipeline_mode<synchronous>, transform_indices = @transform_12, window_bounds = array<i64: 128, 128>}, {pipeline_mode = #tpu.pipeline_mode<synchronous>, transform_indices = @transform_13, window_bounds = array<i64: 1, 128>}, {pipeline_mode = #tpu.pipeline_mode<synchronous>, transform_indices = @transform_14, window_bounds = array<i64: 1, 128>}, {pipeline_mode = #tpu.pipeline_mode<synchronous>, transform_indices = @transform_15, window_bounds = array<i64: 1, 128>}, {pipeline_mode = #tpu.pipeline_mode<synchronous>, transform_indices = @transform_16, window_bounds = array<i64: 128, 512>}, {pipeline_mode = #tpu.pipeline_mode<synchronous>, transform_indices = @transform_17, window_bounds = array<i64: 1, 512>}, {pipeline_mode = #tpu.pipeline_mode<synchronous>, transform_indices = @transform_18, window_bounds = array<i64: 512, 128>}, {pipeline_mode = #tpu.pipeline_mode<synchronous>, transform_indices = @transform_19, window_bounds = array<i64: 1, 128>}, {pipeline_mode = #tpu.pipeline_mode<synchronous>, transform_indices = @transform_20, window_bounds = array<i64: 1, 128>}, {pipeline_mode = #tpu.pipeline_mode<synchronous>, transform_indices = @transform_21, window_bounds = array<i64: 1, 128>}, {transform_indices = @transform_22, window_bounds = array<i64: 1, 8, 128>}]} {
    %c0 = arith.constant 0 : index
    %c0_0 = arith.constant 0 : index
    %c0_1 = arith.constant 0 : index
    %0 = vector.load %arg2[%c0, %c0_0, %c0_1] : memref<1x8x128xf32, #tpu.memory_space<vmem>>, vector<1x8x128xf32>
    %1 = vector.shape_cast %0 : vector<1x8x128xf32> to vector<8x128xf32>
    %c0_2 = arith.constant 0 : index
    %c0_3 = arith.constant 0 : index
    %c0_4 = arith.constant 0 : index
    %2 = vector.load %arg3[%c0_2, %c0_3, %c0_4] : memref<1x24x128xf32, #tpu.memory_space<vmem>>, vector<1x24x128xf32>
    %3 = vector.shape_cast %2 : vector<1x24x128xf32> to vector<24x128xf32>
    %4 = arith.truncf %3 : vector<24x128xf32> to vector<24x128xbf16>
    %c0_5 = arith.constant 0 : index
    %c0_6 = arith.constant 0 : index
    %c0_7 = arith.constant 0 : index
    %c0_8 = arith.constant 0 : index
    %5 = vector.load %arg4[%c0_5, %c0_6, %c0_7, %c0_8] : memref<1x8x8x128xf32, #tpu.memory_space<vmem>>, vector<1x8x8x128xf32>
    %6 = vector.shape_cast %5 : vector<1x8x8x128xf32> to vector<8x8x128xf32>
    %7 = vector.shape_cast %6 : vector<8x8x128xf32> to vector<64x128xf32>
    %c0_9 = arith.constant 0 : index
    %c0_10 = arith.constant 0 : index
    %c0_11 = arith.constant 0 : index
    %c0_12 = arith.constant 0 : index
    %8 = vector.load %arg5[%c0_9, %c0_10, %c0_11, %c0_12] : memref<1x8x8x1xi32, #tpu.memory_space<vmem>>, vector<1x8x8x1xi32>
    %9 = vector.shape_cast %8 : vector<1x8x8x1xi32> to vector<8x8x1xi32>
    %10 = vector.shape_cast %9 : vector<8x8x1xi32> to vector<64x1xi32>
    %c0_13 = arith.constant 0 : index
    %c0_14 = arith.constant 0 : index
    %c0_15 = arith.constant 0 : index
    %c0_16 = arith.constant 0 : index
    %11 = vector.load %arg6[%c0_13, %c0_14, %c0_15, %c0_16] : memref<1x8x8x1xbf16, #tpu.memory_space<vmem>>, vector<1x8x8x1xbf16>
    %12 = vector.shape_cast %11 : vector<1x8x8x1xbf16> to vector<8x8x1xbf16>
    %13 = arith.extf %12 : vector<8x8x1xbf16> to vector<8x8x1xf32>
    %c0_17 = arith.constant 0 : index
    %c0_18 = arith.constant 0 : index
    %c0_19 = arith.constant 0 : index
    %14 = vector.load %arg7[%c0_17, %c0_18, %c0_19] : memref<1x8x1xf32, #tpu.memory_space<vmem>>, vector<1x8x1xf32>
    %15 = vector.shape_cast %14 : vector<1x8x1xf32> to vector<8x1xf32>
    %16 = tpu.iota {dimensions = array<i32: 1>} : vector<64x24xi32>
    %17 = vector.broadcast %10 : vector<64x1xi32> to vector<64x24xi32>
    %18 = arith.cmpi eq, %16, %17 : vector<64x24xi32>
    %19 = arith.extui %18 : vector<64x24xi1> to vector<64x24xi32>
    %20 = arith.sitofp %19 : vector<64x24xi32> to vector<64x24xf32>
    %21 = arith.truncf %20 : vector<64x24xf32> to vector<64x24xbf16>
    %cst = arith.constant dense<0.000000e+00> : vector<64x128xf32>
    %22 = tpu.matmul %21, %4, %cst {dimension_numbers = #tpu.dot_dimension_numbers<[1], [0], [0], [1], [0, 0, 1, 1], [], []>} : vector<64x24xbf16>, vector<24x128xbf16>, vector<64x128xf32> -> vector<64x128xf32>
    %23 = arith.truncf %1 : vector<8x128xf32> to vector<8x128xbf16>
    %c0_20 = arith.constant 0 : index
    %c0_21 = arith.constant 0 : index
    %24 = vector.load %arg8[%c0_20, %c0_21] : memref<128x128xbf16, #tpu.memory_space<vmem>>, vector<128x128xbf16>
    %cst_22 = arith.constant dense<0.000000e+00> : vector<8x128xf32>
    %25 = tpu.matmul %23, %24, %cst_22 {dimension_numbers = #tpu.dot_dimension_numbers<[1], [0], [0], [1], [0, 0, 1, 1], [], []>} : vector<8x128xbf16>, vector<128x128xbf16>, vector<8x128xf32> -> vector<8x128xf32>
    %c0_23 = arith.constant 0 : index
    %c0_24 = arith.constant 0 : index
    %26 = vector.load %arg11[%c0_23, %c0_24] : memref<1x128xf32, #tpu.memory_space<vmem>>, vector<1x128xf32>
    %27 = vector.broadcast %26 : vector<1x128xf32> to vector<8x128xf32>
    %28 = arith.addf %25, %27 : vector<8x128xf32>
    %29 = arith.truncf %7 : vector<64x128xf32> to vector<64x128xbf16>
    %c0_25 = arith.constant 0 : index
    %c0_26 = arith.constant 0 : index
    %30 = vector.load %arg9[%c0_25, %c0_26] : memref<128x128xbf16, #tpu.memory_space<vmem>>, vector<128x128xbf16>
    %cst_27 = arith.constant dense<0.000000e+00> : vector<64x128xf32>
    %31 = tpu.matmul %29, %30, %cst_27 {dimension_numbers = #tpu.dot_dimension_numbers<[1], [0], [0], [1], [0, 0, 1, 1], [], []>} : vector<64x128xbf16>, vector<128x128xbf16>, vector<64x128xf32> -> vector<64x128xf32>
    %32 = arith.truncf %22 : vector<64x128xf32> to vector<64x128xbf16>
    %c0_28 = arith.constant 0 : index
    %c0_29 = arith.constant 0 : index
    %33 = vector.load %arg10[%c0_28, %c0_29] : memref<128x128xbf16, #tpu.memory_space<vmem>>, vector<128x128xbf16>
    %cst_30 = arith.constant dense<0.000000e+00> : vector<64x128xf32>
    %34 = tpu.matmul %32, %33, %cst_30 {dimension_numbers = #tpu.dot_dimension_numbers<[1], [0], [0], [1], [0, 0, 1, 1], [], []>} : vector<64x128xbf16>, vector<128x128xbf16>, vector<64x128xf32> -> vector<64x128xf32>
    %35 = arith.addf %31, %34 : vector<64x128xf32>
    %36 = vector.shape_cast %35 : vector<64x128xf32> to vector<8x8x128xf32>
    %37 = vector.shape_cast %28 : vector<8x128xf32> to vector<8x1x128xf32>
    %38 = vector.broadcast %37 : vector<8x1x128xf32> to vector<8x8x128xf32>
    %39 = arith.addf %36, %38 : vector<8x8x128xf32>
    %40 = vector.shape_cast %39 : vector<8x8x128xf32> to vector<64x128xf32>
    %cst_31 = arith.constant 4.471500e-02 : f32
    %41 = vector.broadcast %cst_31 : f32 to vector<64x128xf32>
    %42 = arith.mulf %41, %40 : vector<64x128xf32>
    %43 = arith.mulf %42, %40 : vector<64x128xf32>
    %44 = arith.mulf %43, %40 : vector<64x128xf32>
    %45 = arith.addf %40, %44 : vector<64x128xf32>
    %cst_32 = arith.constant 0.797884583 : f32
    %46 = vector.broadcast %cst_32 : f32 to vector<64x128xf32>
    %47 = arith.mulf %46, %45 : vector<64x128xf32>
    %cst_33 = arith.constant 5.000000e-01 : f32
    %48 = vector.broadcast %cst_33 : f32 to vector<64x128xf32>
    %49 = arith.mulf %48, %40 : vector<64x128xf32>
    %50 = math.tanh %47 : vector<64x128xf32>
    %cst_34 = arith.constant 1.000000e+00 : f32
    %51 = vector.broadcast %cst_34 : f32 to vector<64x128xf32>
    %52 = arith.addf %51, %50 : vector<64x128xf32>
    %53 = arith.mulf %49, %52 : vector<64x128xf32>
    %54 = arith.truncf %53 : vector<64x128xf32> to vector<64x128xbf16>
    %c0_35 = arith.constant 0 : index
    %c0_36 = arith.constant 0 : index
    %55 = vector.load %arg12[%c0_35, %c0_36] : memref<128x128xbf16, #tpu.memory_space<vmem>>, vector<128x128xbf16>
    %cst_37 = arith.constant dense<0.000000e+00> : vector<64x128xf32>
    %56 = tpu.matmul %54, %55, %cst_37 {dimension_numbers = #tpu.dot_dimension_numbers<[1], [0], [0], [1], [0, 0, 1, 1], [], []>} : vector<64x128xbf16>, vector<128x128xbf16>, vector<64x128xf32> -> vector<64x128xf32>
    %c0_38 = arith.constant 0 : index
    %c0_39 = arith.constant 0 : index
    %57 = vector.load %arg13[%c0_38, %c0_39] : memref<1x128xf32, #tpu.memory_space<vmem>>, vector<1x128xf32>
    %58 = vector.broadcast %57 : vector<1x128xf32> to vector<64x128xf32>
    %59 = arith.addf %56, %58 : vector<64x128xf32>
    %cst_40 = arith.constant 4.471500e-02 : f32
    %60 = vector.broadcast %cst_40 : f32 to vector<64x128xf32>
    %61 = arith.mulf %60, %59 : vector<64x128xf32>
    %62 = arith.mulf %61, %59 : vector<64x128xf32>
    %63 = arith.mulf %62, %59 : vector<64x128xf32>
    %64 = arith.addf %59, %63 : vector<64x128xf32>
    %cst_41 = arith.constant 0.797884583 : f32
    %65 = vector.broadcast %cst_41 : f32 to vector<64x128xf32>
    %66 = arith.mulf %65, %64 : vector<64x128xf32>
    %cst_42 = arith.constant 5.000000e-01 : f32
    %67 = vector.broadcast %cst_42 : f32 to vector<64x128xf32>
    %68 = arith.mulf %67, %59 : vector<64x128xf32>
    %69 = math.tanh %66 : vector<64x128xf32>
    %cst_43 = arith.constant 1.000000e+00 : f32
    %70 = vector.broadcast %cst_43 : f32 to vector<64x128xf32>
    %71 = arith.addf %70, %69 : vector<64x128xf32>
    %72 = arith.mulf %68, %71 : vector<64x128xf32>
    %73 = arith.truncf %72 : vector<64x128xf32> to vector<64x128xbf16>
    %c0_44 = arith.constant 0 : index
    %c0_45 = arith.constant 0 : index
    %74 = vector.load %arg14[%c0_44, %c0_45] : memref<128x128xbf16, #tpu.memory_space<vmem>>, vector<128x128xbf16>
    %cst_46 = arith.constant dense<0.000000e+00> : vector<64x128xf32>
    %75 = tpu.matmul %73, %74, %cst_46 {dimension_numbers = #tpu.dot_dimension_numbers<[1], [0], [0], [1], [0, 0, 1, 1], [], []>} : vector<64x128xbf16>, vector<128x128xbf16>, vector<64x128xf32> -> vector<64x128xf32>
    %c0_47 = arith.constant 0 : index
    %c0_48 = arith.constant 0 : index
    %76 = vector.load %arg15[%c0_47, %c0_48] : memref<1x128xf32, #tpu.memory_space<vmem>>, vector<1x128xf32>
    %77 = vector.broadcast %76 : vector<1x128xf32> to vector<64x128xf32>
    %78 = arith.addf %75, %77 : vector<64x128xf32>
    %79 = vector.shape_cast %78 : vector<64x128xf32> to vector<8x8x128xf32>
    %80 = vector.broadcast %13 : vector<8x8x1xf32> to vector<8x8x128xf32>
    %81 = arith.mulf %79, %80 : vector<8x8x128xf32>
    %cst_49 = arith.constant dense<0.000000e+00> : vector<8x128xf32>
    %82 = vector.multi_reduction <add>, %81, %cst_49 [1] : vector<8x8x128xf32> to vector<8x128xf32>
    %cst_50 = arith.constant 0.0333333351 : f32
    %83 = vector.broadcast %cst_50 : f32 to vector<8x128xf32>
    %84 = arith.mulf %82, %83 : vector<8x128xf32>
    %85 = arith.addf %1, %84 : vector<8x128xf32>
    %c0_51 = arith.constant 0 : index
    %c0_52 = arith.constant 0 : index
    %86 = vector.load %arg16[%c0_51, %c0_52] : memref<1x128xf32, #tpu.memory_space<vmem>>, vector<1x128xf32>
    %c0_53 = arith.constant 0 : index
    %c0_54 = arith.constant 0 : index
    %87 = vector.load %arg17[%c0_53, %c0_54] : memref<1x128xf32, #tpu.memory_space<vmem>>, vector<1x128xf32>
    %cst_55 = arith.constant dense<0.000000e+00> : vector<8xf32>
    %88 = vector.multi_reduction <add>, %85, %cst_55 [1] : vector<8x128xf32> to vector<8xf32>
    %89 = vector.shape_cast %88 : vector<8xf32> to vector<8x1xf32>
    %cst_56 = arith.constant 1.280000e+02 : f32
    %90 = vector.broadcast %cst_56 : f32 to vector<8x1xf32>
    %91 = arith.divf %89, %90 : vector<8x1xf32>
    %92 = vector.broadcast %91 : vector<8x1xf32> to vector<8x128xf32>
    %93 = arith.subf %85, %92 : vector<8x128xf32>
    %94 = arith.mulf %93, %93 : vector<8x128xf32>
    %cst_57 = arith.constant dense<0.000000e+00> : vector<8xf32>
    %95 = vector.multi_reduction <add>, %94, %cst_57 [1] : vector<8x128xf32> to vector<8xf32>
    %96 = vector.shape_cast %95 : vector<8xf32> to vector<8x1xf32>
    %cst_58 = arith.constant 1.280000e+02 : f32
    %97 = vector.broadcast %cst_58 : f32 to vector<8x1xf32>
    %98 = arith.divf %96, %97 : vector<8x1xf32>
    %cst_59 = arith.constant 9.99999974E-6 : f32
    %99 = vector.broadcast %cst_59 : f32 to vector<8x1xf32>
    %100 = arith.addf %98, %99 : vector<8x1xf32>
    %101 = math.rsqrt %100 : vector<8x1xf32>
    %102 = vector.broadcast %101 : vector<8x1xf32> to vector<8x128xf32>
    %103 = arith.mulf %93, %102 : vector<8x128xf32>
    %104 = vector.broadcast %86 : vector<1x128xf32> to vector<8x128xf32>
    %105 = arith.mulf %103, %104 : vector<8x128xf32>
    %106 = vector.broadcast %87 : vector<1x128xf32> to vector<8x128xf32>
    %107 = arith.addf %105, %106 : vector<8x128xf32>
    %108 = arith.truncf %107 : vector<8x128xf32> to vector<8x128xbf16>
    %c0_60 = arith.constant 0 : index
    %c0_61 = arith.constant 0 : index
    %109 = vector.load %arg18[%c0_60, %c0_61] : memref<128x512xbf16, #tpu.memory_space<vmem>>, vector<128x512xbf16>
    %cst_62 = arith.constant dense<0.000000e+00> : vector<8x512xf32>
    %110 = tpu.matmul %108, %109, %cst_62 {dimension_numbers = #tpu.dot_dimension_numbers<[1], [0], [0], [1], [0, 0, 1, 1], [], []>} : vector<8x128xbf16>, vector<128x512xbf16>, vector<8x512xf32> -> vector<8x512xf32>
    %c0_63 = arith.constant 0 : index
    %c0_64 = arith.constant 0 : index
    %111 = vector.load %arg19[%c0_63, %c0_64] : memref<1x512xf32, #tpu.memory_space<vmem>>, vector<1x512xf32>
    %112 = vector.broadcast %111 : vector<1x512xf32> to vector<8x512xf32>
    %113 = arith.addf %110, %112 : vector<8x512xf32>
    %cst_65 = arith.constant 4.471500e-02 : f32
    %114 = vector.broadcast %cst_65 : f32 to vector<8x512xf32>
    %115 = arith.mulf %114, %113 : vector<8x512xf32>
    %116 = arith.mulf %115, %113 : vector<8x512xf32>
    %117 = arith.mulf %116, %113 : vector<8x512xf32>
    %118 = arith.addf %113, %117 : vector<8x512xf32>
    %cst_66 = arith.constant 0.797884583 : f32
    %119 = vector.broadcast %cst_66 : f32 to vector<8x512xf32>
    %120 = arith.mulf %119, %118 : vector<8x512xf32>
    %cst_67 = arith.constant 5.000000e-01 : f32
    %121 = vector.broadcast %cst_67 : f32 to vector<8x512xf32>
    %122 = arith.mulf %121, %113 : vector<8x512xf32>
    %123 = math.tanh %120 : vector<8x512xf32>
    %cst_68 = arith.constant 1.000000e+00 : f32
    %124 = vector.broadcast %cst_68 : f32 to vector<8x512xf32>
    %125 = arith.addf %124, %123 : vector<8x512xf32>
    %126 = arith.mulf %122, %125 : vector<8x512xf32>
    %127 = arith.truncf %126 : vector<8x512xf32> to vector<8x512xbf16>
    %c0_69 = arith.constant 0 : index
    %c0_70 = arith.constant 0 : index
    %128 = vector.load %arg20[%c0_69, %c0_70] : memref<512x128xbf16, #tpu.memory_space<vmem>>, vector<512x128xbf16>
    %cst_71 = arith.constant dense<0.000000e+00> : vector<8x128xf32>
    %129 = tpu.matmul %127, %128, %cst_71 {dimension_numbers = #tpu.dot_dimension_numbers<[1], [0], [0], [1], [0, 0, 1, 1], [], []>} : vector<8x512xbf16>, vector<512x128xbf16>, vector<8x128xf32> -> vector<8x128xf32>
    %c0_72 = arith.constant 0 : index
    %c0_73 = arith.constant 0 : index
    %130 = vector.load %arg21[%c0_72, %c0_73] : memref<1x128xf32, #tpu.memory_space<vmem>>, vector<1x128xf32>
    %131 = vector.broadcast %130 : vector<1x128xf32> to vector<8x128xf32>
    %132 = arith.addf %129, %131 : vector<8x128xf32>
    %133 = arith.addf %107, %132 : vector<8x128xf32>
    %c0_74 = arith.constant 0 : index
    %c0_75 = arith.constant 0 : index
    %134 = vector.load %arg22[%c0_74, %c0_75] : memref<1x128xf32, #tpu.memory_space<vmem>>, vector<1x128xf32>
    %c0_76 = arith.constant 0 : index
    %c0_77 = arith.constant 0 : index
    %135 = vector.load %arg23[%c0_76, %c0_77] : memref<1x128xf32, #tpu.memory_space<vmem>>, vector<1x128xf32>
    %cst_78 = arith.constant dense<0.000000e+00> : vector<8xf32>
    %136 = vector.multi_reduction <add>, %133, %cst_78 [1] : vector<8x128xf32> to vector<8xf32>
    %137 = vector.shape_cast %136 : vector<8xf32> to vector<8x1xf32>
    %cst_79 = arith.constant 1.280000e+02 : f32
    %138 = vector.broadcast %cst_79 : f32 to vector<8x1xf32>
    %139 = arith.divf %137, %138 : vector<8x1xf32>
    %140 = vector.broadcast %139 : vector<8x1xf32> to vector<8x128xf32>
    %141 = arith.subf %133, %140 : vector<8x128xf32>
    %142 = arith.mulf %141, %141 : vector<8x128xf32>
    %cst_80 = arith.constant dense<0.000000e+00> : vector<8xf32>
    %143 = vector.multi_reduction <add>, %142, %cst_80 [1] : vector<8x128xf32> to vector<8xf32>
    %144 = vector.shape_cast %143 : vector<8xf32> to vector<8x1xf32>
    %cst_81 = arith.constant 1.280000e+02 : f32
    %145 = vector.broadcast %cst_81 : f32 to vector<8x1xf32>
    %146 = arith.divf %144, %145 : vector<8x1xf32>
    %cst_82 = arith.constant 9.99999974E-6 : f32
    %147 = vector.broadcast %cst_82 : f32 to vector<8x1xf32>
    %148 = arith.addf %146, %147 : vector<8x1xf32>
    %149 = math.rsqrt %148 : vector<8x1xf32>
    %150 = vector.broadcast %149 : vector<8x1xf32> to vector<8x128xf32>
    %151 = arith.mulf %141, %150 : vector<8x128xf32>
    %152 = vector.broadcast %134 : vector<1x128xf32> to vector<8x128xf32>
    %153 = arith.mulf %151, %152 : vector<8x128xf32>
    %154 = vector.broadcast %135 : vector<1x128xf32> to vector<8x128xf32>
    %155 = arith.addf %153, %154 : vector<8x128xf32>
    %156 = vector.broadcast %15 : vector<8x1xf32> to vector<8x128xf32>
    %157 = arith.mulf %156, %155 : vector<8x128xf32>
    %c0_83 = arith.constant 0 : index
    %c0_84 = arith.constant 0 : index
    %c0_85 = arith.constant 0 : index
    %158 = vector.load %arg24[%c0_83, %c0_84, %c0_85] : memref<1x8x128xf32, #tpu.memory_space<vmem>>, vector<1x8x128xf32>
    %159 = vector.shape_cast %158 : vector<1x8x128xf32> to vector<8x128xf32>
    %160 = vector.shape_cast %157 : vector<8x128xf32> to vector<1x8x128xf32>
    tpu.vector_store %arg24[%c0_83, %c0_84, %c0_85], %160 {strides = array<i32>} : memref<1x8x128xf32, #tpu.memory_space<vmem>>, vector<1x8x128xf32>,
    return
  }
  func.func @transform_0(%arg0: i32, %arg1: i32) -> (i32, i32, i32) {
    %c0_i32 = arith.constant 0 : i32
    %c0_i32_0 = arith.constant 0 : i32
    return %arg0, %arg1, %c0_i32 : i32, i32, i32
  }
  func.func @transform_1(%arg0: i32, %arg1: i32) -> (i32, i32, i32) {
    %c0_i32 = arith.constant 0 : i32
    %c0_i32_0 = arith.constant 0 : i32
    %c0_i32_1 = arith.constant 0 : i32
    return %arg0, %c0_i32, %c0_i32_0 : i32, i32, i32
  }
  func.func @transform_2(%arg0: i32, %arg1: i32) -> (i32, i32, i32, i32) {
    %c0_i32 = arith.constant 0 : i32
    %c0_i32_0 = arith.constant 0 : i32
    %c0_i32_1 = arith.constant 0 : i32
    return %arg0, %arg1, %c0_i32, %c0_i32_0 : i32, i32, i32, i32
  }
  func.func @transform_3(%arg0: i32, %arg1: i32) -> (i32, i32, i32, i32) {
    %c0_i32 = arith.constant 0 : i32
    %c0_i32_0 = arith.constant 0 : i32
    %c0_i32_1 = arith.constant 0 : i32
    return %arg0, %arg1, %c0_i32, %c0_i32_0 : i32, i32, i32, i32
  }
  func.func @transform_4(%arg0: i32, %arg1: i32) -> (i32, i32, i32, i32) {
    %c0_i32 = arith.constant 0 : i32
    %c0_i32_0 = arith.constant 0 : i32
    %c0_i32_1 = arith.constant 0 : i32
    return %arg0, %arg1, %c0_i32, %c0_i32_0 : i32, i32, i32, i32
  }
  func.func @transform_5(%arg0: i32, %arg1: i32) -> (i32, i32, i32) {
    %c0_i32 = arith.constant 0 : i32
    %c0_i32_0 = arith.constant 0 : i32
    return %arg0, %arg1, %c0_i32 : i32, i32, i32
  }
  func.func @transform_6(%arg0: i32, %arg1: i32) -> (i32, i32) {
    %c0_i32 = arith.constant 0 : i32
    %c0_i32_0 = arith.constant 0 : i32
    %c0_i32_1 = arith.constant 0 : i32
    return %c0_i32, %c0_i32_0 : i32, i32
  }
  func.func @transform_7(%arg0: i32, %arg1: i32) -> (i32, i32) {
    %c0_i32 = arith.constant 0 : i32
    %c0_i32_0 = arith.constant 0 : i32
    %c0_i32_1 = arith.constant 0 : i32
    return %c0_i32, %c0_i32_0 : i32, i32
  }
  func.func @transform_8(%arg0: i32, %arg1: i32) -> (i32, i32) {
    %c0_i32 = arith.constant 0 : i32
    %c0_i32_0 = arith.constant 0 : i32
    %c0_i32_1 = arith.constant 0 : i32
    return %c0_i32, %c0_i32_0 : i32, i32
  }
  func.func @transform_9(%arg0: i32, %arg1: i32) -> (i32, i32) {
    %c0_i32 = arith.constant 0 : i32
    %c0_i32_0 = arith.constant 0 : i32
    %c0_i32_1 = arith.constant 0 : i32
    return %c0_i32, %c0_i32_0 : i32, i32
  }
  func.func @transform_10(%arg0: i32, %arg1: i32) -> (i32, i32) {
    %c0_i32 = arith.constant 0 : i32
    %c0_i32_0 = arith.constant 0 : i32
    %c0_i32_1 = arith.constant 0 : i32
    return %c0_i32, %c0_i32_0 : i32, i32
  }
  func.func @transform_11(%arg0: i32, %arg1: i32) -> (i32, i32) {
    %c0_i32 = arith.constant 0 : i32
    %c0_i32_0 = arith.constant 0 : i32
    %c0_i32_1 = arith.constant 0 : i32
    return %c0_i32, %c0_i32_0 : i32, i32
  }
  func.func @transform_12(%arg0: i32, %arg1: i32) -> (i32, i32) {
    %c0_i32 = arith.constant 0 : i32
    %c0_i32_0 = arith.constant 0 : i32
    %c0_i32_1 = arith.constant 0 : i32
    return %c0_i32, %c0_i32_0 : i32, i32
  }
  func.func @transform_13(%arg0: i32, %arg1: i32) -> (i32, i32) {
    %c0_i32 = arith.constant 0 : i32
    %c0_i32_0 = arith.constant 0 : i32
    %c0_i32_1 = arith.constant 0 : i32
    return %c0_i32, %c0_i32_0 : i32, i32
  }
  func.func @transform_14(%arg0: i32, %arg1: i32) -> (i32, i32) {
    %c0_i32 = arith.constant 0 : i32
    %c0_i32_0 = arith.constant 0 : i32
    %c0_i32_1 = arith.constant 0 : i32
    return %c0_i32, %c0_i32_0 : i32, i32
  }
  func.func @transform_15(%arg0: i32, %arg1: i32) -> (i32, i32) {
    %c0_i32 = arith.constant 0 : i32
    %c0_i32_0 = arith.constant 0 : i32
    %c0_i32_1 = arith.constant 0 : i32
    return %c0_i32, %c0_i32_0 : i32, i32
  }
  func.func @transform_16(%arg0: i32, %arg1: i32) -> (i32, i32) {
    %c0_i32 = arith.constant 0 : i32
    %c0_i32_0 = arith.constant 0 : i32
    %c0_i32_1 = arith.constant 0 : i32
    return %c0_i32, %c0_i32_0 : i32, i32
  }
  func.func @transform_17(%arg0: i32, %arg1: i32) -> (i32, i32) {
    %c0_i32 = arith.constant 0 : i32
    %c0_i32_0 = arith.constant 0 : i32
    %c0_i32_1 = arith.constant 0 : i32
    return %c0_i32, %c0_i32_0 : i32, i32
  }
  func.func @transform_18(%arg0: i32, %arg1: i32) -> (i32, i32) {
    %c0_i32 = arith.constant 0 : i32
    %c0_i32_0 = arith.constant 0 : i32
    %c0_i32_1 = arith.constant 0 : i32
    return %c0_i32, %c0_i32_0 : i32, i32
  }
  func.func @transform_19(%arg0: i32, %arg1: i32) -> (i32, i32) {
    %c0_i32 = arith.constant 0 : i32
    %c0_i32_0 = arith.constant 0 : i32
    %c0_i32_1 = arith.constant 0 : i32
    return %c0_i32, %c0_i32_0 : i32, i32
  }
  func.func @transform_20(%arg0: i32, %arg1: i32) -> (i32, i32) {
    %c0_i32 = arith.constant 0 : i32
    %c0_i32_0 = arith.constant 0 : i32
    %c0_i32_1 = arith.constant 0 : i32
    return %c0_i32, %c0_i32_0 : i32, i32
  }
  func.func @transform_21(%arg0: i32, %arg1: i32) -> (i32, i32) {
    %c0_i32 = arith.constant 0 : i32
    %c0_i32_0 = arith.constant 0 : i32
    %c0_i32_1 = arith.constant 0 : i32
    return %c0_i32, %c0_i32_0 : i32, i32
  }
  func.func @transform_22(%arg0: i32, %arg1: i32) -> (i32, i32, i32) {
    %c0_i32 = arith.constant 0 : i32
    %c0_i32_0 = arith.constant 0 : i32
    return %arg0, %arg1, %c0_i32 : i32, i32, i32
  }
}

</mosaic_0001>

<bundles_post_ra>
// kernel: tpu_custom_call.1
= control target key start
LH: loop header
LB: loop body
LE: loop exit
PB: predicated region body
PF: predicated region fallthrough
CT: control target
= control target key end

     0   :  { %s5276_s0 = inlined_call_operand.hbm [shape: f32[2,24,128], index: 0, kind: input, shape index: {}]   ;;  %s5277_s1 = inlined_call_operand.hbm [shape: f32[2,24,128], index: 1, kind: input, shape index: {}]   ;;  %s5278_s2 = inlined_call_operand.vmem [shape: f32[2,24,8,128], index: 2, kind: input, shape index: {}]   ;;  %s5279_s3 = inlined_call_operand.vmem [shape: s32[2,24,8,1], index: 3, kind: input, shape index: {}]   ;;  %s5280_s4 = inlined_call_operand.vmem [shape: bf16[2,24,8,1], index: 4, kind: input, shape index: {}]   ;;  %s5281_s5 = inlined_call_operand.vmem [shape: f32[2,24,1], index: 5, kind: input, shape index: {}]   ;;  %s5282_s6 = inlined_call_operand.hbm [shape: bf16[128,128], index: 6, kind: input, shape index: {}]   ;;  %s5283_s7 = inlined_call_operand.hbm [shape: bf16[128,128], index: 7, kind: input, shape index: {}]   ;;  %s5284_s8 = inlined_call_operand.hbm [shape: bf16[128,128], index: 8, kind: input, shape index: {}]   ;;  %s5285_s9 = inlined_call_operand.vmem [shape: f32[1,128], index: 9, kind: input, shape index: {}]   ;;  %s5286_s10 = inlined_call_operand.hbm [shape: bf16[128,128], index: 10, kind: input, shape index: {}]   ;;  %s5287_s11 = inlined_call_operand.vmem [shape: f32[1,128], index: 11, kind: input, shape index: {}]   ;;  %s5288_s12 = inlined_call_operand.hbm [shape: bf16[128,128], index: 12, kind: input, shape index: {}]   ;;  %s5289_s13 = inlined_call_operand.vmem [shape: f32[1,128], index: 13, kind: input, shape index: {}]   ;;  %s5290_s14 = inlined_call_operand.vmem [shape: f32[1,128], index: 14, kind: input, shape index: {}]   ;;  %s5291_s15 = inlined_call_operand.vmem [shape: f32[1,128], index: 15, kind: input, shape index: {}]   ;;  %s5292_s16 = inlined_call_operand.vmem [shape: bf16[128,512], index: 16, kind: input, shape index: {}]   ;;  %s5293_s17 = inlined_call_operand.vmem [shape: f32[1,512], index: 17, kind: input, shape index: {}]   ;;  %s5294_s18 = inlined_call_operand.hbm [shape: bf16[512,128], index: 18, kind: input, shape index: {}]   ;;  %s5295_s19 = inlined_call_operand.vmem [shape: f32[1,128], index: 19, kind: input, shape index: {}]   ;;  %s5296_s20 = inlined_call_operand.vmem [shape: f32[1,128], index: 20, kind: input, shape index: {}]   ;;  %s5297_s21 = inlined_call_operand.vmem [shape: f32[1,128], index: 21, kind: input, shape index: {}]   ;;  %s5298_s22 = inlined_call_operand.hbm [shape: f32[2,24,128], index: 22, kind: output, shape index: {}]  }
   0x1   :  { %5320 = sst [smem:[#allocation30_spill]] %s5276_s0 }
   0x2   :  { %5321 = sst [smem:[#allocation31_spill]] %s5277_s1 }
   0x3   :  { %5322 = sst [smem:[#allocation32_spill]] %s5278_s2 }
   0x4   :  { %5323 = sst [smem:[#allocation33_spill]] %s5279_s3 }
   0x5   :  { %5324 = sst [smem:[#allocation34_spill]] %s5280_s4 }
   0x6   :  { %5325 = sst [smem:[#allocation35_spill]] %s5281_s5 }
   0x7   :  { %5326 = sst [smem:[#allocation36_spill]] %s5282_s6 }
   0x8   :  { %5327 = sst [smem:[#allocation37_spill]] %s5283_s7 }
   0x9   :  { %5328 = sst [smem:[#allocation38_spill]] %s5284_s8 }
   0xa   :  { %5329 = sst [smem:[#allocation39_spill]] %s5285_s9 }
   0xb   :  { %5330 = sst [smem:[#allocation40_spill]] %s5286_s10 }
   0xc   :  { %5331 = sst [smem:[#allocation41_spill]] %s5287_s11 }
   0xd   :  { %5332 = sst [smem:[#allocation42_spill]] %s5288_s12 }
   0xe   :  { %5333 = sst [smem:[#allocation43_spill]] %s5289_s13 }
   0xf   :  { %5334 = sst [smem:[#allocation44_spill]] %s5290_s14 }
  0x10   :  { %5335 = sst [smem:[#allocation45_spill]] %s5291_s15 }
  0x11   :  { %5336 = sst [smem:[#allocation46_spill]] %s5292_s16 }
  0x12   :  { %5337 = sst [smem:[#allocation47_spill]] %s5293_s17 }
  0x13   :  { %5338 = sst [smem:[#allocation48_spill]] %s5294_s18 }
  0x14   :  { %5339 = sst [smem:[#allocation49_spill]] %s5295_s19 }
  0x15   :  { %5340 = sst [smem:[#allocation50_spill]] %s5296_s20 }
  0x16   :  { %5341 = sst [smem:[#allocation51_spill]] %s5297_s21 }
  0x17   :  { %5342 = sst [smem:[#allocation52_spill]] %s5298_s22 }
  0x18   :  { %27 = vsyncpa [#allocation3], 0 }
  0x19   :  { %29 = vsyncpa [#allocation3 + $0x1], 0 }
  0x1a   :  { %30 = vsyncpa [#allocation6], 0 }
  0x1b   :  { %32 = vsyncpa [#allocation6 + $0x1], 0 }
  0x1c   :  { %33 = vsyncpa [#allocation9], 0 }
  0x1d   :  { %34 = vsyncpa [#allocation12], 0 }
  0x1e   :  { %35 = vsyncpa [#allocation15], 0 }
  0x1f   :  { %36 = vsyncpa [#allocation4], 0 }
  0x20   :  { %38 = vsyncpa [#allocation4 + $0x1], 0  ;;  %s4476_s3 = smov 0   ;;  %s4478_s28 = smov 0  }
  0x21   :  { %s4480_s29 = smov 0   ;;  %s4482_s30 = smov 0  }
  0x22   :  { %s4484_s4 = smov 0   ;;  %s4486_s0 = smov 0  }
  0x23   :  { %s4488_s23 = smov 0   ;;  %s4490_s1 = smov 0  }
  0x24   :  { %s4492_s5 = smov 0   ;;  %s4494_s24 = smov 0  }
  0x25   :  { %s4496_s6 = smov 0  }
  0x26 LB: > { %5343 = sst [smem:[#allocation24_spill]] %s4302_s3  ;;  %s4532_s25 = sadd.s32 4294967295, %s4342_s6   ;;  %s4342_s6 = sphi %s4496_s6, %s44_s6   ;;  %s4338_s24 = sphi %s4494_s24, %s5417_s24   ;;  %s4334_s5 = sphi %s4492_s5, %s5416_s5   ;;  %s4330_s1 = sphi %s4490_s1, %s5415_s1   ;;  %s4326_s23 = sphi %s4488_s23, %s5414_s23   ;;  %s4322_s0 = sphi %s4486_s0, %s5413_s0   ;;  %s4318_s4 = sphi %s4484_s4, %s5412_s4   ;;  %s4314_s30 = sphi %s4482_s30, %s5411_s30   ;;  %s4310_s29 = sphi %s4480_s29, %s5410_s29   ;;  %s4306_s28 = sphi %s4478_s28, %s5409_s28   ;;  %s4302_s3 = sphi %s4476_s3, %s5408_s3  }
  0x27   : > { %5344 = sst [smem:[#allocation25_spill]] %s4326_s23  ;;  %p3185_p0 = scmp.ge.s32.totalorder %s4342_s6, 1 }
  0x28   : > { %5345 = sst [smem:[#allocation26_spill]] %s4330_s1  ;;  %p5307_p1 = scmp.eq.s32.totalorder %s4532_s25, 0 }
  0x29   : > { %p591_p2 = scmp.lt.s32.totalorder %s4342_s6, 7  ;;  %s4344_s2 = smov [#allocation7]  }
  0x2a   : > { %s603_s27 = sshll.u32 %s4344_s2, 4  ;;  %s4345_s21 = smov [#allocation8]   ;;  %s4541_s27 = int_to_ptr.vmem [resolvable:$true] %s603_s27 }
  0x2b   : > { %p4537_p3 = pnand %p3185_p0, %p591_p2  ;;  %s616_s20 = sshll.u32 %s4345_s21, 4  ;;  %s4551_s20 = int_to_ptr.vmem [resolvable:$true] %s616_s20 }
  0x2c   : > { %s4346_s19 = smov [#allocation11]   ;;  %s5349_s2 = sld [smem:[#allocation36_spill]] }
  0x2d   : > { %s5346_s26 = scalar_select %p4537_p3, 1, 0 }
  0x2e   : > { %p3640_p4 = pneg %p4537_p3  ;;  %s4553_s17 = sshll.u32 %s4346_s19, 4  ;;  %s646_s17 = int_to_ptr.vmem [resolvable:$true] %s4553_s17 }
  0x2f   : > { %5347 = sst [smem:[#allocation27_spill]] %s5346_s26 }
  0x30   : > { %p4547_p5 = pnand %p3640_p4, %p5307_p1 }
  0x32   : > { %s3972_s16 = scalar_lea.hbm %s5349_s2, 1024  ;;  %p4563_p7 = pneg %p4547_p5 }
  0x33   : > { %p3973_p6 = scmp.ne.s32.totalorder %s5349_s2, %s3972_s16  ;;  %p3979_p10 = scmp.lt.u32.totalorder %s3972_s16, %s5349_s2 }
  0x35   : > { %p3975_p8 = pnand %p4563_p7, %p3973_p6 }
  0x37   : > { %p3976_p9 = pneg %p3975_p8 }
  0x39   : > { %p3981_p11 = pnand %p3979_p10, %p3976_p9 }
  0x3b   : > { %3984 = shalt.err (!%p3981_p11)
}
  0x3c   : > { %s3985_s11 = scalar_lea.vmem %s4541_s27, 1024  ;;  %p3993_p2 = scmp.lt.s32.totalorder %s4541_s27, %s4541_s27 }
  0x3d   : > { %p3986_p12 = scmp.ne.s32.totalorder %s4541_s27, %s3985_s11  ;;  %p3994_p4 = scmp.lt.s32.totalorder %s3985_s11, %s3985_s11 }
  0x3f   : > { %p3988_p13 = pnand %p3986_p12, %p4563_p7  ;;  %p3995_p6 = por %p3994_p4, %p3993_p2 }
  0x41   : > { %p3989_p0 = pneg %p3988_p13 }
  0x43   : > { %p3996_p8 = pnand %p3995_p6, %p3989_p0 }
  0x45   : > { %3999 = shalt.err (!%p3996_p8)
}
  0x46   : > { %s4347_s13 = smov 64   ;;  %s4348_s14 = smov 4  }
  0x47   : > { %3643 = dma.hbm_to_vmem [thread:$0]  (!%p4547_p5), %s5349_s2, 1024, %s4541_s27, [#allocation6], %s4347_s13, %s4347_s13, %s4348_s14  }
  0x48   : > { %s5351_s7 = sld [smem:[#allocation37_spill]] }
  0x4e   : > { %s4000_s11 = scalar_lea.hbm %s5351_s7, 1024 }
  0x4f   : > { %p4001_p9 = scmp.ne.s32.totalorder %s5351_s7, %s4000_s11  ;;  %p4007_p12 = scmp.lt.u32.totalorder %s4000_s11, %s5351_s7 }
  0x51   : > { %p4003_p10 = pnand %p4001_p9, %p4563_p7 }
  0x53   : > { %p4004_p11 = pneg %p4003_p10 }
  0x55   : > { %p4009_p13 = pnand %p4007_p12, %p4004_p11 }
  0x57   : > { %4012 = shalt.err (!%p4009_p13)
}
  0x58   : > { %s4013_s27 = scalar_lea.vmem %s4551_s20, 1024  ;;  %p4021_p6 = scmp.lt.s32.totalorder %s4551_s20, %s4551_s20 }
  0x59   : > { %p4014_p0 = scmp.ne.s32.totalorder %s4551_s20, %s4013_s27  ;;  %p4022_p8 = scmp.lt.s32.totalorder %s4013_s27, %s4013_s27 }
  0x5b   : > { %p4016_p2 = pnand %p4014_p0, %p4563_p7  ;;  %p4023_p9 = por %p4022_p8, %p4021_p6 }
  0x5d   : > { %p4017_p4 = pneg %p4016_p2 }
  0x5f   : > { %p4024_p10 = pnand %p4023_p9, %p4017_p4 }
  0x61   : > { %4027 = shalt.err (!%p4024_p10)
}
  0x62   : > { %3646 = dma.hbm_to_vmem [thread:$0]  (!%p4547_p5), %s5351_s7, 1024, %s4551_s20, [#allocation9], %s4347_s13, %s4347_s13, %s4348_s14  }
  0x63   : > { %s5352_s10 = sld [smem:[#allocation40_spill]] }
  0x69   : > { %s4028_s15 = scalar_lea.hbm %s5352_s10, 1024 }
  0x6a   : > { %p4029_p11 = scmp.ne.s32.totalorder %s5352_s10, %s4028_s15  ;;  %p4035_p0 = scmp.lt.u32.totalorder %s4028_s15, %s5352_s10 }
  0x6c   : > { %p4031_p12 = pnand %p4029_p11, %p4563_p7 }
  0x6e   : > { %p4032_p13 = pneg %p4031_p12 }
  0x70   : > { %p4037_p2 = pnand %p4035_p0, %p4032_p13 }
  0x72   : > { %4040 = shalt.err (!%p4037_p2)
}
  0x73   : > { %s4041_s27 = scalar_lea.vmem %s646_s17, 1024  ;;  %p4049_p9 = scmp.lt.s32.totalorder %s646_s17, %s646_s17 }
  0x74   : > { %p4042_p4 = scmp.ne.s32.totalorder %s646_s17, %s4041_s27  ;;  %p4050_p10 = scmp.lt.s32.totalorder %s4041_s27, %s4041_s27 }
  0x76   : > { %p4044_p6 = pnand %p4042_p4, %p4563_p7  ;;  %p4051_p1 = por %p4050_p10, %p4049_p9 }
  0x78   : > { %p4045_p8 = pneg %p4044_p6 }
  0x7a   : > { %p4052_p3 = pnand %p4051_p1, %p4045_p8 }
  0x7c   : > { %4055 = shalt.err (!%p4052_p3)
}
  0x7d   : > { %3652 = dma.hbm_to_vmem [thread:$0]  (!%p4547_p5), %s5352_s10, 1024, %s646_s17, [#allocation12], %s4347_s13, %s4347_s13, %s4348_s14  }
  0x7e   : > { %s4349_s23 = smov [#allocation10]   ;;  %s4350_s26 = smov [#allocation13]  }
  0x7f   : > { %s629_s1 = sshll.u32 %s4349_s23, 4  ;;  %s661_s15 = sshll.u32 %s4350_s26, 4  ;;  %s630_s1 = int_to_ptr.vmem [resolvable:$true] %s629_s1  ;;  %s662_s15 = int_to_ptr.vmem [resolvable:$true] %s661_s15 }
  0x80   : > { %s5353_s8 = sld [smem:[#allocation38_spill]] }
  0x86   : > { %s4056_s19 = scalar_lea.hbm %s5353_s8, 1024 }
  0x87   : > { %p4057_p1 = scmp.ne.s32.totalorder %s5353_s8, %s4056_s19  ;;  %p4063_p12 = scmp.lt.u32.totalorder %s4056_s19, %s5353_s8 }
  0x89   : > { %p4059_p3 = pnand %p4057_p1, %p4563_p7 }
  0x8b   : > { %p4060_p11 = pneg %p4059_p3 }
  0x8d   : > { %p4065_p13 = pnand %p4063_p12, %p4060_p11 }
  0x8f   : > { %4068 = shalt.err (!%p4065_p13)
}
  0x90   : > { %s4069_s17 = scalar_lea.vmem %s630_s1, 1024  ;;  %p4077_p6 = scmp.lt.s32.totalorder %s630_s1, %s630_s1 }
  0x91   : > { %p4070_p0 = scmp.ne.s32.totalorder %s630_s1, %s4069_s17  ;;  %p4078_p8 = scmp.lt.s32.totalorder %s4069_s17, %s4069_s17 }
  0x93   : > { %p4072_p2 = pnand %p4070_p0, %p4563_p7  ;;  %p4079_p9 = por %p4078_p8, %p4077_p6 }
  0x95   : > { %p4073_p4 = pneg %p4072_p2 }
  0x97   : > { %p4080_p10 = pnand %p4079_p9, %p4073_p4 }
  0x99   : > { %4083 = shalt.err (!%p4080_p10)
}
  0x9a   : > { %3649 = dma.hbm_to_vmem [thread:$0]  (!%p4547_p5), %s5353_s8, 1024, %s630_s1, [#allocation9], %s4347_s13, %s4347_s13, %s4348_s14  }
  0x9b   : > { %s5354_s12 = sld [smem:[#allocation42_spill]] }
  0xa1   : > { %s4084_s16 = scalar_lea.hbm %s5354_s12, 1024 }
  0xa2   : > { %p4085_p1 = scmp.ne.s32.totalorder %s5354_s12, %s4084_s16  ;;  %p4091_p12 = scmp.lt.u32.totalorder %s4084_s16, %s5354_s12 }
  0xa4   : > { %p4087_p3 = pnand %p4085_p1, %p4563_p7 }
  0xa6   : > { %p4088_p11 = pneg %p4087_p3 }
  0xa8   : > { %p4093_p13 = pnand %p4091_p12, %p4088_p11 }
  0xaa   : > { %4096 = shalt.err (!%p4093_p13)
}
  0xab   : > { %s4097_s20 = scalar_lea.vmem %s662_s15, 1024  ;;  %p4105_p6 = scmp.lt.s32.totalorder %s662_s15, %s662_s15 }
  0xac   : > { %p4098_p0 = scmp.ne.s32.totalorder %s662_s15, %s4097_s20  ;;  %p4106_p8 = scmp.lt.s32.totalorder %s4097_s20, %s4097_s20 }
  0xae   : > { %p4100_p2 = pnand %p4098_p0, %p4563_p7  ;;  %p4107_p9 = por %p4106_p8, %p4105_p6 }
  0xb0   : > { %p4101_p4 = pneg %p4100_p2 }
  0xb2   : > { %p4108_p10 = pnand %p4107_p9, %p4101_p4 }
  0xb4   : > { %4111 = shalt.err (!%p4108_p10)
}
  0xb5   : > { %3655 = dma.hbm_to_vmem [thread:$0]  (!%p4547_p5), %s5354_s12, 1024, %s662_s15, [#allocation12], %s4347_s13, %s4347_s13, %s4348_s14  }
  0xb6   : > { %s4351_s2 = smov [#allocation14]   ;;  %s5355_s18 = sld [smem:[#allocation48_spill]] }
  0xb7   : > { %s689_s3 = sshll.u32 %s4351_s2, 4  ;;  %s690_s3 = int_to_ptr.vmem [resolvable:$true] %s689_s3 }
  0xbc   : > { %s4112_s16 = scalar_lea.hbm %s5355_s18, 4096 }
  0xbd   : > { %p4113_p1 = scmp.ne.s32.totalorder %s5355_s18, %s4112_s16  ;;  %p4119_p12 = scmp.lt.u32.totalorder %s4112_s16, %s5355_s18 }
  0xbf   : > { %p4115_p3 = pnand %p4113_p1, %p4563_p7 }
  0xc1   : > { %p4116_p11 = pneg %p4115_p3 }
  0xc3   : > { %p4121_p13 = pnand %p4119_p12, %p4116_p11 }
  0xc5   : > { %4124 = shalt.err (!%p4121_p13)
}
  0xc6   : > { %s4125_s15 = scalar_lea.vmem %s690_s3, 4096  ;;  %p4133_p6 = scmp.lt.s32.totalorder %s690_s3, %s690_s3 }
  0xc7   : > { %p4126_p0 = scmp.ne.s32.totalorder %s690_s3, %s4125_s15  ;;  %p4134_p8 = scmp.lt.s32.totalorder %s4125_s15, %s4125_s15 }
  0xc9   : > { %p4128_p2 = pnand %p4126_p0, %p4563_p7  ;;  %p4135_p9 = por %p4134_p8, %p4133_p6 }
  0xcb   : > { %p4129_p4 = pneg %p4128_p2 }
  0xcd   : > { %p4136_p10 = pnand %p4135_p9, %p4129_p4 }
  0xcf   : > { %4139 = shalt.err (!%p4136_p10)
}
  0xd0   : > { %3658 = dma.hbm_to_vmem [thread:$0]  (!%p4547_p5), %s5355_s18, 4096, %s690_s3, [#allocation15], %s4347_s13, %s4347_s13, %s4348_s14  }
  0xd1   : > { %s3184_s9 = sadd.s32 4294967294, %s4342_s6   ;;  %s53_s22 = sadd.s32 1, %s4334_s5 }
  0xd2   : > { %p54_p7 = scmp.ge.s32.totalorder %s53_s22, 3  ;;  %s5356_s17 = sld [smem:[#allocation24_spill]] }
  0xd3   : > { %s56_s2 = sadd.s32 1, %s4338_s24  ;;  %s65_s23 = sadd.s32 1, %s4322_s0 }
  0xd4   : > { %p72_p1 = scmp.ne.s32.totalorder %s4322_s0, %s4318_s4  ;;  %s5419_s22 = smov (%p54_p7, %s53_s22), 0 }
  0xd5   : > { %5357 = sst [smem:[#allocation28_spill]] %s5419_s22  ;;  %s5421_s2 = smov (!%p54_p7, %s56_s2), %s4338_s24 }
  0xd6   : > { %s61_s13 = ssub.s32 %s4334_s5, %s5419_s22  ;;  %p73_p5 = scmp.eq.s32.totalorder %s4342_s6, 0 }
  0xd7   : > { %p58_p3 = scmp.ge.s32.totalorder %s5421_s2, 2  ;;  %p5310_p11 = scmp.ne.s32.totalorder %s4318_s4, %s4314_s30 }
  0xd8   : > { %p4717_p12 = por %p73_p5, %p72_p1  ;;  %s91_s3 = sadd.s32 1, %s4310_s29 }
  0xd9   : > { %s5423_s2 = smov (%p58_p3, %s5421_s2), 0  ;;  %p5360_p13 = scmp.eq.s32.totalorder %s4532_s25, 0 }
  0xda   : > { %5359 = sst [smem:[#allocation29_spill]] %s5423_s2  ;;  %p98_p2 = scmp.ne.s32.totalorder %s4310_s29, %s4306_s28 }
  0xdb   : > { %p4729_p0 = por %p5360_p13, %p5310_p11  ;;  %s60_s16 = ssub.s32 %s4338_s24, %s5423_s2 }
  0xdc   : > { %p104_p4 = scmp.ne.s32.totalorder %s4306_s28, %s5356_s17  ;;  %s62_s21 = sor.u32 %s61_s13, %s60_s16 }
  0xdd   : > { %s5361_s26 = scalar_select %p4729_p0, 1, 0 }
  0xde   : > { %p89_p6 = scmp.eq.s32.totalorder %s60_s16, 0  ;;  %p63_p8 = scmp.eq.s32.totalorder %s62_s21, 0 }
  0xdf   : > { %p4741_p9 = por %p98_p2, %p73_p5  ;;  %p5363_p10 = pmov %p5360_p13 }
  0xe0   : > { %s4746_s11 = scalar_select %p89_p6, %s4310_s29, %s91_s3  }
  0xe1   : > { %s4749_s27 = scalar_select %p63_p8, %s4322_s0, %s65_s23  }
  0xe2   : > { %p4753_p7 = por %p104_p4, %p5363_p10  ;;  %p578_p3 = scmp.eq.s32.totalorder %s4532_s25, 5 }
  0xe3   : > { %p584_p13 = scmp.eq.s32.totalorder %s3184_s9, 5  ;;  %p5313_p11 = scmp.lt.s32.totalorder %s4342_s6, 6 }
  0xe4   : > { %s5364_s15 = scalar_select %p4753_p7, 1, 0 }
  0xe5   : > { %p4762_p0 = por %p578_p3, %p72_p1  ;;  %s712_s1 = sand.u32 1, %s4322_s0  }
  0xe6   : > { %p5366_p5 = scmp.ne.s32.totalorder %s4318_s4, %s4314_s30  ;;  %s3193_s23 = sshll.u32 %s712_s1, 3 }
  0xe7   : > { %s5365_s20 = scalar_select %p4762_p0, 1, 0 }
  0xe8   : > { %p4770_p2 = por %p584_p13, %p5366_p5  ;;  %s3603_s13 = smul.u32 3, %s4338_s24 }
  0xe9   : > { %p4779_p4 = pnand %p5313_p11, %p4717_p12  ;;  %s716_s16 = scalar_lea.vmem [#allocation2], %s3193_s23 }
  0xea   : > { %s5367_s17 = scalar_select %p4770_p2, 1, 0 }
  0xeb   : > { %s721_s9 = sadd.s32 %s4334_s5, %s3603_s13  ;;  %s725_s21 = sshll.u32 %s716_s16, 4  ;;  %s4784_s21 = int_to_ptr.vmem [resolvable:$true] %s725_s21 }
  0xec   : > { %s3194_s7 = sshll.u32 %s721_s9, 7  ;;  %s5369_s12 = sld [smem:[#allocation30_spill]] }
  0xed   : > { %s713_s14 = scalar_lea.sflag [#allocation3], %s712_s1  ;;  %p4142_p12 = pneg %p4779_p4 }
  0xf2   : > { %s4789_s18 = scalar_lea.hbm %s5369_s12, %s3194_s7  ;;  %s4145_s9 = scalar_lea.hbm %s5369_s12, 768 }
  0xf3   : > { %s4140_s2 = scalar_lea.hbm %s4789_s18, 128  ;;  %p4146_p10 = scmp.lt.u32.totalorder %s4789_s18, %s5369_s12 }
  0xf4   : > { %p4141_p1 = scmp.ne.s32.totalorder %s4789_s18, %s4140_s2  ;;  %p4147_p3 = scmp.lt.u32.totalorder %s4145_s9, %s4140_s2 }
  0xf5   : > { %p4149_p5 = scmp.lt.u32.totalorder %s4140_s2, %s4789_s18 }
  0xf6   : > { %p4143_p6 = pnand %p4142_p12, %p4141_p1  ;;  %p4148_p13 = por %p4147_p3, %p4146_p10 }
  0xf8   : > { %p4144_p8 = pneg %p4143_p6  ;;  %p4150_p11 = por %p4149_p5, %p4148_p13 }
  0xfa   : > { %p4151_p2 = pnand %p4150_p11, %p4144_p8 }
  0xfc   : > { %4154 = shalt.err (!%p4151_p2)
}
  0xfd   : > { %s4155_s10 = scalar_lea.vmem %s4784_s21, 128  ;;  %s4352_s1 = smov [#allocation2]  }
  0xfe   : > { %p4156_p1 = scmp.ne.s32.totalorder %s4784_s21, %s4155_s10  ;;  %s4160_s16 = sshll.u32 %s4352_s1, 4  ;;  %s4161_s16 = int_to_ptr.vmem [resolvable:$false] %s4160_s16 }
  0xff   : > { %s4162_s23 = scalar_lea.vmem %s4161_s16, 256  ;;  %p4163_p7 = scmp.lt.s32.totalorder %s4784_s21, %s4161_s16 }
 0x100   : > { %p4158_p6 = pnand %p4156_p1, %p4142_p12  ;;  %p4164_p10 = scmp.lt.s32.totalorder %s4162_s23, %s4155_s10 }
 0x102   : > { %p4159_p0 = pneg %p4158_p6  ;;  %p4165_p3 = por %p4164_p10, %p4163_p7 }
 0x104   : > { %p4166_p13 = pnand %p4165_p3, %p4159_p0 }
 0x106   : > { %4169 = shalt.err (!%p4166_p13)
}
 0x107   : > { %3662 = dma.hbm_to_vmem [thread:$0]  (!%p4779_p4), %s4789_s18, 128, %s4784_s21, %s713_s14  }
 0x108   : > { %p5370_p11 = scmp.lt.s32.totalorder %s4342_s6, 6  ;;  %s732_s13 = sand.u32 1, %s4342_s6  }
 0x109   : > { %s734_s9 = sand.u32 1, %s4310_s29   ;;  %s3605_s3 = smul.u32 384, %s4338_s24 }
 0x10a   : > { %p4820_p2 = pnand %p5370_p11, %p4741_p9  ;;  %s3604_s8 = smul.u32 24, %s734_s9 }
 0x10b   : > { %s5372_s1 = sld [smem:[#allocation31_spill]]  ;;  %s4834_s21 = scalar_lea.sflag [#allocation6], %s732_s13 }
 0x10c   : > { %s736_s18 = scalar_lea.vmem [#allocation5], %s3604_s8  ;;  %p4172_p9 = pneg %p4820_p2 }
 0x10d   : > { %s743_s19 = sshll.u32 %s736_s18, 4  ;;  %s4832_s19 = int_to_ptr.vmem [resolvable:$true] %s743_s19 }
 0x111   : > { %s5373_s16 = smov %s5372_s1  ;;  %s4830_s23 = scalar_lea.hbm %s5372_s1, %s3605_s3 }
 0x112   : > { %s4170_s14 = scalar_lea.hbm %s4830_s23, 384  ;;  %s4175_s7 = scalar_lea.hbm %s5373_s16, 768 }
 0x113   : > { %p4171_p0 = scmp.ne.s32.totalorder %s4830_s23, %s4170_s14  ;;  %p4176_p12 = scmp.lt.u32.totalorder %s4830_s23, %s5373_s16 }
 0x114   : > { %p4177_p8 = scmp.lt.u32.totalorder %s4175_s7, %s4170_s14  ;;  %p4179_p1 = scmp.lt.u32.totalorder %s4170_s14, %s4830_s23 }
 0x115   : > { %p4173_p7 = pnand %p4172_p9, %p4171_p0 }
 0x116   : > { %p4178_p5 = por %p4177_p8, %p4176_p12 }
 0x117   : > { %p4174_p4 = pneg %p4173_p7 }
 0x118   : > { %p4180_p6 = por %p4179_p1, %p4178_p5 }
 0x11a   : > { %p4181_p10 = pnand %p4180_p6, %p4174_p4 }
 0x11c   : > { %4184 = shalt.err (!%p4181_p10)
}
 0x11d   : > { %s4185_s13 = scalar_lea.vmem %s4832_s19, 384  ;;  %s4353_s8 = smov [#allocation5]  }
 0x11e   : > { %p4186_p3 = scmp.ne.s32.totalorder %s4832_s19, %s4185_s13  ;;  %s4190_s18 = sshll.u32 %s4353_s8, 4  ;;  %s4191_s18 = int_to_ptr.vmem [resolvable:$false] %s4190_s18 }
 0x11f   : > { %s4192_s9 = scalar_lea.vmem %s4191_s18, 768  ;;  %p4193_p0 = scmp.lt.s32.totalorder %s4832_s19, %s4191_s18 }
 0x120   : > { %p4188_p13 = pnand %p4186_p3, %p4172_p9  ;;  %p4194_p7 = scmp.lt.s32.totalorder %s4192_s9, %s4185_s13 }
 0x122   : > { %p4189_p11 = pneg %p4188_p13  ;;  %p4195_p12 = por %p4194_p7, %p4193_p0 }
 0x124   : > { %p4196_p8 = pnand %p4195_p12, %p4189_p11 }
 0x126   : > { %4199 = shalt.err (!%p4196_p8)
}
 0x127   : > { %s4354_s14 = smov 128   ;;  %s4355_s3 = smov 8  }
 0x128   : > { %3665 = dma.hbm_to_vmem [thread:$0]  (!%p4820_p2), %s4830_s23, 384, %s4832_s19, %s4834_s21, %s4354_s14, %s4354_s14, %s4355_s3  }
 0x129   : > { %s5374_s7 = sld [smem:[#allocation27_spill]] }
 0x12f   : > { %p5375_p9 = scmp.ne.s32.totalorder %s5374_s7, 0 }
 0x130   : > { %s4865_s10 = sand.u32 (!%p5375_p9), 1, %s4318_s4   ;;  %p5376_p4 = scmp.ne.s32.totalorder (!%p5375_p9), %s5361_s26, 0 }
 0x131   : > { %805 = sbr.rel (%p5375_p9) target bundleno = 2574 (0xa0e), region = 108  ;;  %s5316_s1 = sshll.u32 (!%p5375_p9), %s4865_s10, 3 }
 0x132   : > { %s808_s13 = scalar_lea.sflag (!%p5375_p9), [#allocation3], %s4865_s10  ;;  %s4871_s8 = scalar_lea.vmem (!%p5375_p9), [#allocation2], %s5316_s1 }
 0x138   : > { %4273 = dma.done.wait (%p5376_p4), %s808_s13, 128  }
 0x139   : > { %4275 = vsyncadd (%p5376_p4), %s808_s13, 4294967168  ;;  %s816_s2 = sand.u32 1, %s4532_s25   ;;  %s818_s23 = sand.u32 1, %s4306_s28  }
 0x13a   : > { %s3606_s19 = smul.u32 24, %s818_s23  ;;  %s817_s21 = scalar_lea.sflag [#allocation6], %s816_s2 }
 0x13b   : > { %p5377_p2 = scmp.ne.s32.totalorder %s5364_s15, 0 }
 0x13c   : > { %s4879_s18 = scalar_lea.vmem [#allocation5], %s3606_s19 }
 0x13d   : > { %4277 = dma.done.wait (%p5377_p2), %s817_s21, 384  }
 0x13e   : > { %4279 = vsyncadd (%p5377_p2), %s817_s21, 4294966912  ;;  %p5378_p5 = scmp.eq.s32.totalorder %s4532_s25, 0 }
 0x140   : > { %4281 = dma.done.wait (%p5378_p5), [#allocation6], 1024   ;;  %p5379_p1 = pmov %p5378_p5 }
 0x142   : > { %4283 = vsyncadd (%p5379_p1), [#allocation6], 4294966272  ;;  %p5380_p6 = pmov %p5379_p1 }
 0x143   : > { %p5381_p10 = pmov %p5379_p1 }
 0x144   : > { %4285 = dma.done.wait (%p5380_p6), [#allocation9], 2048  }
 0x145   : > { %4287 = vsyncadd (%p5381_p10), [#allocation9], 4294965248  ;;  %p5382_p3 = pmov %p5379_p1 }
 0x146   : > { %p5383_p13 = pmov %p5379_p1 }
 0x147   : > { %4289 = dma.done.wait (%p5382_p3), [#allocation12], 2048  }
 0x148   : > { %4291 = vsyncadd (%p5383_p13), [#allocation12], 4294965248  ;;  %p5384_p11 = pmov %p5379_p1 }
 0x149   : > { %p5385_p0 = pmov %p5379_p1 }
 0x14a   : > { %4293 = dma.done.wait (%p5384_p11), [#allocation15], 4096  }
 0x14b   : > { %4295 = vsyncadd (%p5385_p0), [#allocation15], 4294963200  ;;  %s5386_s26 = sld [smem:[#allocation25_spill]]  ;;  %s5387_s15 = sld [smem:[#allocation26_spill]]  ;;  %v4356_v0 = vmov 0   ;;  %v4357_v1 = vmov 0.0   ;;  %v1023_v34 = vlaneseq }
 0x14c   : > { %3787 = vset.pattern.permute.xlu1 %v4356_v0  ;;  %3786 = vset.pattern.permute.xlu0 %v4356_v0  ;;  %s5388_s19 = sld [smem:[#allocation33_spill]]  ;;  %v985_v2 = vld [vmem:[%s4879_s18] sm:$0xff]  ;;  %v986_v3 = vld [vmem:[%s4879_s18 + $0x8] sm:$0xff]  ;;  %s5389_s1 = sld [smem:[#allocation34_spill]]  ;;  %v987_v13 = vld [vmem:[%s4879_s18 + $0x10] sm:$0xff]  ;;  %vm1090_vm0 = vcmask 1043456  }
 0x14d   : > { %3478 = vmatprep.subr.bf16.mxu1 %v4357_v1  ;;  %v988_v6 = vpack.c.bf16 %v986_v3, %v985_v2  ;;  %v989_v14 = vpack.c.bf16 %v987_v13, %v987_v13  ;;  %v3808_v32 = vld [vmem:[#allocation10] sm:$0xff]   ;;  %v1024_v35 = vand.u32 127, %v1023_v34  ;;  %vm1077_vm5 = vcmask 195584   ;;  %v3809_v48 = vld [vmem:[#allocation10 + $0x8] sm:$0xff]   ;;  %v3810_v54 = vld [vmem:[#allocation10 + $0x10] sm:$0xff]   ;;  %s5390_s18 = sld [smem:[#allocation32_spill]] }
 0x14e   : > { %v3814_v33 = vld [vmem:[#allocation7] sm:$0xff]   ;;  %v3811_v58 = vld [vmem:[#allocation10 + $0x18] sm:$0xff]   ;;  %v3813_v60 = vld [vmem:[#allocation10 + $0x28] sm:$0xff]   ;;  %vm4358_vm10 = vmmov 0   ;;  %vm2171_vm11 = vcmask 1041409   ;;  %vm2173_vm12 = vcmask 1042434  }
 0x14f   : > { %3466 = vmatprep.subr.bf16.mxu0 %v988_v6  ;;  %v1092_v16 = vsel %vm1090_vm0, %v989_v14, 0  ;;  %3479 = vmatpush3.bf16.msra.mxu1 %v3814_v33  ;;  %v3812_v59 = vld [vmem:[#allocation10 + $0x20] sm:$0xff]   ;;  %v3815_v61 = vld [vmem:[#allocation10 + $0x30] sm:$0xff]   ;;  %v3816_v62 = vld [vmem:[#allocation7 + $0x8] sm:$0xff]   ;;  %vm2175_vm13 = vcmask 1043459   ;;  %vm2177_vm14 = vcmask 1044484  }
 0x150   : > { %3467 = vmatpush3.bf16.msra.mxu0 %v988_v6  ;;  %3480 = vmatprep.subr.bf16.mxu1 %v4357_v1  ;;  %v3817_v63 = vld [vmem:[#allocation10 + $0x38] sm:$0xff]   ;;  %v3818_v2 = vld [vmem:[#allocation7 + $0x10] sm:$0xff]   ;;  %v3819_v3 = vld [vmem:[#allocation8] sm:$0xff]   ;;  %vm2179_vm15 = vcmask 1045509   ;;  %s5395_s2 = sld [smem:[#allocation35_spill]]  ;;  %s5397_s16 = sld [smem:[#allocation45_spill]] }
 0x151   : > { %s3205_s9 = sshll.u32 %s5386_s26, 3  ;;  %p946_p7 = scmp.lt.s32.totalorder %s5387_s15, 1  ;;  %3602 = vmatprep.subr.msk.bf16.mxu0 %vm1090_vm0, %v989_v14  ;;  %v3824_v6 = vld [vmem:[#allocation7 + $0x28] sm:$0xff]   ;;  %3494 = vmatprep.mubr.msk.bf16.mxu1 %vm4358_vm10, %v4357_v1  ;;  %vm2181_vm0 = vcmask 1046534  }
 0x152   : > { %p948_p12 = scmp.lt.s32.totalorder %s3205_s9, 23  ;;  %p977_p8 = scmp.lt.s32.totalorder %s5386_s26, 2 }
 0x153   : > { %s4906_s14 = scalar_select %p946_p7, %s5387_s15, 1  ;;  %3481 = vmatpush3.bf16.msra.mxu1 %v3816_v62 }
 0x154   : > { %s5425_s9 = smov (!%p948_p12, %s3205_s9), 23  ;;  %3469 = vmatpush3.bf16.msra.mxu0 %v1092_v16  ;;  %3482 = vmatprep.subr.bf16.mxu1 %v4357_v1  ;;  %s5401_s22 = sld [smem:[#allocation51_spill]] }
 0x155   : > { %s3607_s25 = smul.u32 24, %s4906_s14  ;;  %3498 = vmatprep.subr.bf16.mxu0 %v3808_v32  ;;  %p5404_p4 = scmp.ne.s32.totalorder %s5365_s20, 0 }
 0x157   : > { %s4910_s3 = sadd.s32 %s3607_s25, %s5425_s9  ;;  %3483 = vmatpush3.bf16.msra.mxu1 %v3818_v2  ;;  %s5393_s25 = sld [smem:[#allocation43_spill]] }
 0x158   : > { %s3206_s7 = sshll.u32 %s4910_s3, 3  ;;  %s3210_s13 = sshll.u32 %s4910_s3, 2  ;;  %3484 = vmatprep.subr.bf16.mxu1 %v4357_v1 }
 0x159   : > { %s963_s21 = scalar_lea.vmem %s5388_s19, %s3206_s7  ;;  %s973_s12 = scalar_lea.vmem %s5389_s1, %s3210_s13 }
 0x15a   : > { %v1000_v4 = vld [vmem:[%s963_s21 + $0x10] sm:$0xff]  ;;  %v998_v5 = vld [vmem:[%s963_s21] sm:$0xff]  ;;  %v1001_v7 = vld [vmem:[%s963_s21 + $0x18] sm:$0xff]  ;;  %s4956_s13 = scalar_lea.vmem %s5390_s18, %s3206_s7  ;;  %s5391_s7 = sld [smem:[#allocation39_spill]] }
 0x15b   : > { %1032 = vperm.xlu1 %3787, %v1000_v4   ;;  %1026 = vperm.xlu0 %3786, %v998_v5   ;;  %v999_v8 = vld [vmem:[%s963_s21 + $0x8] sm:$0xff]  ;;  %v1002_v10 = vld [vmem:[%s963_s21 + $0x20] sm:$0xff]  ;;  %v3358_v15 = vld [vmem:[%s973_s12 + $0x18] sm:$0xff]   ;;  %s5392_s19 = sld [smem:[#allocation41_spill]]  ;;  %s5394_s18 = sld [smem:[#allocation46_spill]] }
 0x15c   : > { %v1003_v9 = vld [vmem:[%s963_s21 + $0x28] sm:$0xff]  ;;  %v3341_v12 = vld [vmem:[%s973_s12] sm:$0xff]   ;;  %v1005_v17 = vld [vmem:[%s963_s21 + $0x38] sm:$0xff]  ;;  %v3354_v24 = vunpack.c.l.bf16 %v3358_v15  ;;  %v3355_v25 = vunpack.c.h.bf16 %v3358_v15  ;;  %s978_s1 = scalar_select %p977_p8, %s5386_s26, 2 }
 0x15d   : > { %v3356_v11 = vld [vmem:[%s973_s12 + $0x8] sm:$0xff]   ;;  %v1004_v18 = vld [vmem:[%s963_s21 + $0x30] sm:$0xff]  ;;  %v3342_v22 = vunpack.c.l.bf16 %v3341_v12  ;;  %v3343_v23 = vunpack.c.h.bf16 %v3341_v12  ;;  %v3820_v4 = vld [vmem:[#allocation7 + $0x18] sm:$0xff]   ;;  %s5398_s21 = sld [smem:[#allocation47_spill]] }
 0x15e   : > { %v3357_v19 = vld [vmem:[%s973_s12 + $0x10] sm:$0xff]   ;;  %v3346_v20 = vunpack.c.l.bf16 %v3356_v11  ;;  %v3347_v21 = vunpack.c.h.bf16 %v3356_v11  ;;  %v3803_v30 = vpack.i.bf16 %v3355_v25, %v3354_v24  ;;  %3485 = vmatpush3.bf16.msra.mxu1 %v3820_v4  ;;  %v3822_v5 = vld [vmem:[#allocation7 + $0x20] sm:$0xff]   ;;  %v993_v33 = vld [vmem:[%s4956_s13 + $0x18] sm:$0xff]  ;;  %s3608_s12 = smul.u32 3, %s4906_s14  ;;  %s5399_s14 = sld [smem:[#allocation49_spill]] }
 0x15f   : > { %1035 = vperm.xlu1 %3787, %v1001_v7   ;;  %1029 = vperm.xlu0 %3786, %v999_v8   ;;  %v3788_v27 = vpack.i.bf16 %v3343_v23, %v3342_v22  ;;  %v3350_v28 = vunpack.c.l.bf16 %v3357_v19  ;;  %v3351_v29 = vunpack.c.h.bf16 %v3357_v19  ;;  %v3826_v7 = vld [vmem:[#allocation7 + $0x30] sm:$0xff]   ;;  %v3828_v8 = vld [vmem:[#allocation7 + $0x38] sm:$0xff]  }
 0x160   : > { %v3793_v26 = vpack.i.bf16 %v3347_v21, %v3346_v20  ;;  %3486 = vmatprep.subr.bf16.mxu1 %v4357_v1  ;;  %v3823_v19 = vld [vmem:[#allocation8 + $0x10] sm:$0xff]   ;;  %v990_v20 = vld [vmem:[%s4956_s13] sm:$0xff]  ;;  %v991_v21 = vld [vmem:[%s4956_s13 + $0x8] sm:$0xff] }
 0x161   : > { %v3798_v31 = vpack.i.bf16 %v3351_v29, %v3350_v28  ;;  %v3827_v28 = vld [vmem:[#allocation8 + $0x20] sm:$0xff]   ;;  %v3829_v29 = vld [vmem:[#allocation8 + $0x28] sm:$0xff]  }
 0x162   : > { %3487 = vmatpush3.bf16.msra.mxu1 %v3822_v5 }
 0x163   : > { %1041 = vperm.xlu1 %3787, %v1003_v9   ;;  %1038 = vperm.xlu0 %3786, %v1002_v10   ;;  %v4947_v9 = vld [vmem:[%s4871_s8] sm:$0xff] }
 0x164   : > { %3488 = vmatprep.subr.bf16.mxu1 %v4357_v1  ;;  %v1159_v10 = vpack.c.bf16 %v4947_v9, %v4947_v9 }
 0x166   : > { %3489 = vmatpush3.bf16.msra.mxu1 %v3824_v6 }
 0x167   : > { %1047 = vperm.xlu1 %3787, %v1005_v17   ;;  %1044 = vperm.xlu0 %3786, %v1004_v18   ;;  %v3821_v17 = vld [vmem:[#allocation8 + $0x8] sm:$0xff]  }
 0x168   : > { %3490 = vmatprep.subr.bf16.mxu1 %v4357_v1 }
 0x16a   : > { %3491 = vmatpush3.bf16.msra.mxu1 %v3826_v7 }
 0x16b   : > { %3794 = vperm.xlu1 %3787, %v3793_v26   ;;  %3789 = vperm.xlu0 %3786, %v3788_v27   ;;  %v1271_v26 = vpack.c.bf16 %v991_v21, %v990_v20  ;;  %v3825_v27 = vld [vmem:[#allocation8 + $0x18] sm:$0xff]  }
 0x16c   : > { %3492 = vmatprep.subr.bf16.mxu1 %v4357_v1 }
 0x16e   : > { %3493 = vmatpush3.bf16.msra.mxu1 %v3828_v8 }
 0x16f   : > { %3804 = vperm.xlu1 %3787, %v3803_v30   ;;  %3799 = vperm.xlu0 %3786, %v3798_v31   ;;  %v3830_v30 = vld [vmem:[#allocation8 + $0x30] sm:$0xff]   ;;  %v3831_v31 = vld [vmem:[#allocation8 + $0x38] sm:$0xff]  }
 0x171   : > { %3495 = vmatmul.mubr.bf16.vlgmr.msra.gmra.mrb[0].mxu1 %v1159_v10 }
 0x1da   : > { %v1033_v36 = vpop.permute.xlu1 %1032  ;;  %v1027_v37 = vpop.permute.xlu0 %1026 }
 0x1db   : > { %vm1051_vm1 = vcmp.eq.s32.totalorder %v1024_v35, %v1033_v36  ;;  %vm1049_vm2 = vcmp.eq.s32.totalorder %v1024_v35, %v1027_v37  ;;  %v995_v36 = vld [vmem:[%s4956_s13 + $0x28] sm:$0xff] }
 0x1dc   : > { %v3214_v40 = vsel %vm1051_vm1, 1.0, %v4357_v1  ;;  %v3212_v41 = vsel %vm1049_vm2, 1.0, %v4357_v1  ;;  %vm2183_vm1 = vcmask 1047559  }
 0x1de   : > { %v1036_v38 = vpop.permute.xlu1 %1035  ;;  %v1030_v39 = vpop.permute.xlu0 %1029 }
 0x1df   : > { %vm1052_vm3 = vcmp.eq.s32.totalorder %v1024_v35, %v1036_v38  ;;  %vm1050_vm4 = vcmp.eq.s32.totalorder %v1024_v35, %v1030_v39  ;;  %v996_v39 = vld [vmem:[%s4956_s13 + $0x30] sm:$0xff] }
 0x1e0   : > { %v3215_v42 = vsel %vm1052_vm3, 1.0, %v4357_v1  ;;  %v3213_v43 = vsel %vm1050_vm4, 1.0, %v4357_v1 }
 0x1e1   : > { %v1074_v44 = vpack.c.bf16 %v3215_v42, %v3214_v40  ;;  %v1073_v45 = vpack.c.bf16 %v3213_v43, %v3212_v41  ;;  %v997_v40 = vld [vmem:[%s4956_s13 + $0x38] sm:$0xff] }
 0x1e2   : > { %v1042_v46 = vpop.permute.xlu1 %1041  ;;  %v1039_v47 = vpop.permute.xlu0 %1038  ;;  %v1274_v41 = vpack.c.bf16 %v997_v40, %v996_v39 }
 0x1e3   : > { %vm1054_vm6 = vcmp.eq.s32.totalorder %v1024_v35, %v1042_v46  ;;  %vm1053_vm7 = vcmp.eq.s32.totalorder %v1024_v35, %v1039_v47  ;;  %3470 = vmatprep.mubr.msk.bf16.mxu0 %vm1077_vm5, %v1073_v45  ;;  %v3832_v46 = vld [vmem:[#allocation11] sm:$0xff]   ;;  %v3833_v47 = vld [vmem:[#allocation11 + $0x8] sm:$0xff]  }
 0x1e4   : > { %v3217_v49 = vsel %vm1054_vm6, 1.0, %v4357_v1  ;;  %v3216_v50 = vsel %vm1053_vm7, 1.0, %v4357_v1  ;;  %3471 = vmatmul.mubr.msk.bf16.vlgmr.msra.gmra.mrb[0].mxu0 %vm1077_vm5, %v1074_v44  ;;  %3546 = vmatprep.subr.bf16.mxu1 %v3832_v46 }
 0x1e5   : > { %v1075_v51 = vpack.c.bf16 %v3217_v49, %v3216_v50  ;;  %3499 = vmatpush3.bf16.msra.mxu0 %v3808_v32  ;;  %v992_v32 = vld [vmem:[%s4956_s13 + $0x10] sm:$0xff]  ;;  %3547 = vmatpush3.bf16.msra.mxu1 %v3832_v46  ;;  %v3835_v49 = vld [vmem:[#allocation11 + $0x18] sm:$0xff]   ;;  %v3836_v50 = vld [vmem:[#allocation11 + $0x20] sm:$0xff]  }
 0x1e6   : > { %v1048_v52 = vpop.permute.xlu1 %1047  ;;  %v1045_v53 = vpop.permute.xlu0 %1044  ;;  %3500 = vmatprep.subr.bf16.mxu0 %v3809_v48  ;;  %v1272_v37 = vpack.c.bf16 %v993_v33, %v992_v32  ;;  %3548 = vmatprep.subr.bf16.mxu1 %v3833_v47 }
 0x1e7   : > { %vm1056_vm8 = vcmp.eq.s32.totalorder %v1024_v35, %v1048_v52  ;;  %vm1055_vm9 = vcmp.eq.s32.totalorder %v1024_v35, %v1045_v53  ;;  %3474 = vmatprep.mubr.msk.bf16.mxu0 %vm1077_vm5, %v1075_v51  ;;  %v994_v35 = vld [vmem:[%s4956_s13 + $0x20] sm:$0xff]  ;;  %v3837_v51 = vld [vmem:[#allocation11 + $0x28] sm:$0xff]   ;;  %v3838_v52 = vld [vmem:[#allocation11 + $0x30] sm:$0xff]   ;;  %s980_s13 = sadd.s32 %s3608_s12, %s978_s1  ;;  %s3609_s12 = smul.u32 3, %s5387_s15 }
 0x1e8   : > { %v3219_v55 = vsel %vm1056_vm8, 1.0, %v4357_v1  ;;  %v3218_v56 = vsel %vm1055_vm9, 1.0, %v4357_v1  ;;  %v1273_v38 = vpack.c.bf16 %v995_v36, %v994_v35  ;;  %v3839_v53 = vld [vmem:[#allocation11 + $0x38] sm:$0xff]   ;;  %s3211_s8 = sshll.u32 %s980_s13, 3  ;;  %s4360_s1 = smov [#allocation16]  }
 0x1e9   : > { %v1076_v57 = vpack.c.bf16 %v3219_v55, %v3218_v56  ;;  %3501 = vmatpush3.bf16.msra.mxu0 %v3809_v48  ;;  %3549 = vmatpush3.bf16.msra.mxu1 %v3833_v47  ;;  %v3834_v48 = vld [vmem:[#allocation11 + $0x10] sm:$0xff]   ;;  %s982_s23 = scalar_lea.vmem %s5395_s2, %s3211_s8  ;;  %s5400_s8 = sld [smem:[#allocation50_spill]] }
 0x1ea   : > { %3502 = vmatprep.subr.bf16.mxu0 %v3810_v54  ;;  %3550 = vmatprep.subr.bf16.mxu1 %v3834_v48  ;;  %s2942_s3 = sadd.s32 %s5386_s26, %s3609_s12  ;;  %s2931_s26 = scalar_lea.sflag [#allocation4], %s4865_s10 }
 0x1eb   : > { %s4204_s13 = sshll.u32 %s4360_s1, 4  ;;  %s4205_s13 = int_to_ptr.vmem [resolvable:$false] %s4204_s13 }
 0x1ec   : > { %3475 = vmatmul.mubr.msk.bf16.gmra.mrb[4].mxu0 %vm1077_vm5, %v1076_v57  ;;  %v4968_v57 = vshrl.u32 %v1023_v34, 7 }
 0x1ed   : > { %3503 = vmatpush3.bf16.msra.mxu0 %v3810_v54  ;;  %3551 = vmatpush3.bf16.msra.mxu1 %v3834_v48  ;;  %v4359_v54 = vmov 1966171168  }
 0x1ee   : > { %3504 = vmatprep.subr.bf16.mxu0 %v3811_v58  ;;  %3552 = vmatprep.subr.bf16.mxu1 %v3835_v49  ;;  %v1540_v55 = vunpack.c.l.s4 %v4359_v54  ;;  %v4975_v6 = vsub.s32 0, %v4968_v57 }
 0x1f0   : > { %v1541_v56 = vunpack.c.0.s8 %v1540_v55 }
 0x1f1   : > { %3505 = vmatpush3.bf16.msra.mxu0 %v3811_v58  ;;  %3553 = vmatpush3.bf16.msra.mxu1 %v3835_v49  ;;  %v3224_v58 = vld [vmem:[%s5391_s7] ss:$0 sm:$0xff]  ;;  %s5396_s7 = sld [smem:[#allocation44_spill]] }
 0x1f2   : > { %3506 = vmatprep.subr.bf16.mxu0 %v3812_v59  ;;  %3554 = vmatprep.subr.bf16.mxu1 %v3836_v50 }
 0x1f5   : > { %3507 = vmatpush3.bf16.msra.mxu0 %v3812_v59  ;;  %3555 = vmatpush3.bf16.msra.mxu1 %v3836_v50 }
 0x1f6   : > { %3508 = vmatprep.subr.bf16.mxu0 %v3813_v60  ;;  %3556 = vmatprep.subr.bf16.mxu1 %v3837_v51 }
 0x1f9   : > { %3509 = vmatpush3.bf16.msra.mxu0 %v3813_v60  ;;  %3557 = vmatpush3.bf16.msra.mxu1 %v3837_v51  ;;  %v1544_v60 = vsub.s32 %v1541_v56, %v4968_v57 }
 0x1fa   : > { %3510 = vmatprep.subr.bf16.mxu0 %v3815_v61  ;;  %3558 = vmatprep.subr.bf16.mxu1 %v3838_v52 }
 0x1fd   : > { %3511 = vmatpush3.bf16.msra.mxu0 %v3815_v61  ;;  %3559 = vmatpush3.bf16.msra.mxu1 %v3838_v52 }
 0x1fe   : > { %3512 = vmatprep.subr.bf16.mxu0 %v3817_v63  ;;  %3560 = vmatprep.subr.bf16.mxu1 %v3839_v53 }
 0x201   : > { %3513 = vmatpush3.bf16.msra.mxu0 %v3817_v63  ;;  %3561 = vmatpush3.bf16.msra.mxu1 %v3839_v53 }
 0x202   : > { %3522 = vmatprep.subr.bf16.mxu0 %v3819_v3 }
 0x244   : > { %v1265_v42 = vpop.f32.mrb[0].mxu1 }
 0x245   : > { %v3496_v43 = vpop.f32.mrb[1].mxu1  ;;  %v1266_v59 = vadd.f32 %v3224_v58, %v1265_v42 }
 0x246   : > { %v1268_v44 = vpop.f32.mrb[2].mxu1 }
 0x247   : > { %v3497_v45 = vpop.f32.mrb[3].mxu1  ;;  %v1545_v61 = vrot.slane %v1266_v59, %v1544_v60  ;;  %v1538_v63 = vcombine.high %v1266_v59, %v1266_v59 }
 0x249   : > { %v1553_v62 = vcombine.high %v1545_v61, %v1545_v61  ;;  %v1561_v2 = vrot.slane %v1545_v61, %v1544_v60  ;;  %v1552_v4 = vrot.slane %v1538_v63, %v1544_v60 }
 0x24b   : > { %v1583_v5 = vcombine.high %v1561_v2, %v1561_v2  ;;  %v1554_v34 = vcombine.high %v1552_v4, %v1552_v4  ;;  %v1590_v10 = vrot.slane %v1561_v2, %v4975_v6 }
 0x24d   : > { %v1598_v8 = vrot.slane %v1583_v5, %v4975_v6 }
 0x2b7   : > { %v3472_v11 = vpop.f32.mrb[0].mxu0 }
 0x2b8   : > { %v1128_v12 = vpop.f32.mrb[1].mxu0 }
 0x2b9   : > { %v3473_v13 = vpop.f32.mrb[2].mxu0 }
 0x2ba   : > { %v1292_v14 = vpack.c.bf16 %v3473_v13, %v3472_v11  ;;  %v1131_v15 = vpop.f32.mrb[3].mxu0 }
 0x2bb   : > { %v1291_v16 = vpack.c.bf16 %v1131_v15, %v1128_v12  ;;  %v1568_v12 = vrot.slane %v1552_v4, %v1544_v60 }
 0x2bd   : > { %3514 = vmatprep.mubr.bf16.mxu0 %v1291_v16 }
 0x2be   : > { %3515 = vmatmul.mubr.bf16.vlgmr.msra.gmra.mrb[8].mxu0 %v1292_v14 }
 0x2bf   : > { %3523 = vmatpush3.bf16.msra.mxu0 %v3819_v3  ;;  %v3476_v1 = vpop.f32.mrb[4].mxu0  ;;  %v1575_v3 = vrot.slane %v1553_v62, %v1544_v60 }
 0x2c0   : > { %v1144_v18 = vpop.f32.mrb[5].mxu0  ;;  %3524 = vmatprep.subr.bf16.mxu0 %v3821_v17 }
 0x2c1   : > { %v3477_v22 = vpop.f32.mrb[6].mxu0  ;;  %v1585_v7 = vcombine.high %v1575_v3, %v1575_v3  ;;  %v1594_v14 = vrot.slane %v1575_v3, %v4975_v6 }
 0x2c2   : > { %v1294_v23 = vpack.c.bf16 %v3477_v22, %v3476_v1  ;;  %v1147_v24 = vpop.f32.mrb[7].mxu0  ;;  %v1584_v22 = vcombine.high %v1568_v12, %v1568_v12 }
 0x2c3   : > { %v1293_v25 = vpack.c.bf16 %v1147_v24, %v1144_v18  ;;  %3525 = vmatpush3.bf16.msra.mxu0 %v3821_v17  ;;  %v1602_v11 = vrot.slane %v1585_v7, %v4975_v6  ;;  %v1582_v17 = vrot.slane %v1554_v34, %v1544_v60 }
 0x2c4   : > { %3526 = vmatprep.subr.bf16.mxu0 %v3823_v19  ;;  %v1614_v32 = vrot.slane %v1584_v22, %v4975_v6 }
 0x2c5   : > { %3518 = vmatprep.mubr.bf16.mxu0 %v1293_v25  ;;  %v1610_v46 = vrot.slane %v1582_v17, %v4975_v6 }
 0x2c6   : > { %3519 = vmatmul.mubr.bf16.gmra.mrb[12].mxu0 %v1294_v23 }
 0x2c7   : > { %3527 = vmatpush3.bf16.msra.mxu0 %v3823_v19  ;;  %3538 = vmatprep.mubr.bf16.mxu0 %v1271_v26 }
 0x2c8   : > { %3528 = vmatprep.subr.bf16.mxu0 %v3825_v27 }
 0x2cb   : > { %3529 = vmatpush3.bf16.msra.mxu0 %v3825_v27  ;;  %v1586_v27 = vcombine.high %v1582_v17, %v1582_v17 }
 0x2cc   : > { %3530 = vmatprep.subr.bf16.mxu0 %v3827_v28 }
 0x2cd   : > { %v1618_v42 = vrot.slane %v1586_v27, %v4975_v6 }
 0x2cf   : > { %3531 = vmatpush3.bf16.msra.mxu0 %v3827_v28 }
 0x2d0   : > { %3532 = vmatprep.subr.bf16.mxu0 %v3829_v29 }
 0x2d3   : > { %3533 = vmatpush3.bf16.msra.mxu0 %v3829_v29 }
 0x2d4   : > { %3534 = vmatprep.subr.bf16.mxu0 %v3830_v30 }
 0x2d7   : > { %3535 = vmatpush3.bf16.msra.mxu0 %v3830_v30 }
 0x2d8   : > { %3536 = vmatprep.subr.bf16.mxu0 %v3831_v31 }
 0x2db   : > { %3537 = vmatpush3.bf16.msra.mxu0 %v3831_v31 }
 0x2de   : > { %3539 = vmatmul.mubr.bf16.vlgmr.msra.gmra.mrb[8].mxu0 %v1272_v37  ;;  %v1606_v37 = vrot.slane %v1568_v12, %v4975_v6 }
 0x2df   : > { %3542 = vmatprep.mubr.bf16.mxu0 %v1273_v38 }
 0x2e6   : > { %3543 = vmatmul.mubr.bf16.gmra.mrb[12].mxu0 %v1274_v41 }
 0x2e7   : > { %2462 = vmatprep.mubr.bf16.mxu0 %v4356_v0 }
 0x3b1   : > { %v3540_v13 = vpop.f32.mrb[8].mxu0 }
 0x3b2   : > { %v4981_v15 = vadd.f32 %v3540_v13, %v1598_v8  ;;  %v1506_v16 = vpop.f32.mrb[9].mxu0 }
 0x3b3   : > { %v4983_v1 = vadd.f32 %v1590_v10, %v1506_v16  ;;  %v3541_v18 = vpop.f32.mrb[10].mxu0 }
 0x3b4   : > { %v1637_v19 = vmul.f32 0.044715, %v4981_v15  ;;  %v4986_v20 = vadd.f32 %v3541_v18, %v1602_v11  ;;  %v1509_v21 = vpop.f32.mrb[11].mxu0 }
 0x3b5   : > { %v1635_v23 = vmul.f32 0.044715, %v4983_v1  ;;  %v4989_v24 = vadd.f32 %v1594_v14, %v1509_v21 }
 0x3b6   : > { %v1645_v25 = vmul.f32 %v1637_v19, %v4981_v15  ;;  %v1638_v26 = vmul.f32 0.044715, %v4986_v20  ;;  %v1678_v27 = vmul.f32 0.5, %v4986_v20 }
 0x3b7   : > { %v1643_v28 = vmul.f32 %v1635_v23, %v4983_v1  ;;  %v1636_v29 = vmul.f32 0.044715, %v4989_v24 }
 0x3b8   : > { %v1653_v30 = vmul.f32 %v1645_v25, %v4981_v15  ;;  %v1646_v31 = vmul.f32 %v1638_v26, %v4986_v20  ;;  %v1677_v26 = vmul.f32 0.5, %v4981_v15 }
 0x3b9   : > { %v1651_v33 = vmul.f32 %v1643_v28, %v4983_v1  ;;  %v1644_v35 = vmul.f32 %v1636_v29, %v4989_v24  ;;  %v3544_v36 = vpop.f32.mrb[12].mxu0  ;;  %v1675_v29 = vmul.f32 0.5, %v4983_v1 }
 0x3ba   : > { %v1661_v38 = vadd.f32 %v1653_v30, %v4981_v15  ;;  %v1654_v39 = vmul.f32 %v1646_v31, %v4986_v20  ;;  %v5003_v40 = vadd.f32 %v3544_v36, %v1614_v32  ;;  %v1522_v41 = vpop.f32.mrb[13].mxu0  ;;  %v1676_v30 = vmul.f32 0.5, %v4989_v24 }
 0x3bb   : > { %v1652_v43 = vmul.f32 %v1644_v35, %v4989_v24  ;;  %v5007_v44 = vadd.f32 %v1606_v37, %v1522_v41  ;;  %v3545_v45 = vpop.f32.mrb[14].mxu0  ;;  %v1659_v47 = vadd.f32 %v1651_v33, %v4983_v1 }
 0x3bc   : > { %v1669_v48 = vmul.f32 0.7978846, %v1661_v38  ;;  %v1662_v49 = vadd.f32 %v1654_v39, %v4986_v20  ;;  %v1641_v50 = vmul.f32 0.044715, %v5003_v40  ;;  %v1634_v51 = vadd.f32 %v3545_v45, %v1618_v42  ;;  %v1525_v52 = vpop.f32.mrb[15].mxu0 }
 0x3bd   : > { %v1639_v53 = vmul.f32 0.044715, %v5007_v44  ;;  %v1632_v54 = vadd.f32 %v1610_v46, %v1525_v52  ;;  %v1660_v55 = vadd.f32 %v1652_v43, %v4989_v24  ;;  %v1667_v56 = vmul.f32 0.7978846, %v1659_v47 }
 0x3be   : > { %3928 = vtanh.f32 %v1669_v48  ;;  %v1670_v58 = vmul.f32 0.7978846, %v1662_v49  ;;  %v1649_v59 = vmul.f32 %v1641_v50, %v5003_v40  ;;  %v1642_v60 = vmul.f32 0.044715, %v1634_v51 }
 0x3bf   : > { %v1647_v61 = vmul.f32 %v1639_v53, %v5007_v44  ;;  %v1640_v62 = vmul.f32 0.044715, %v1632_v54  ;;  %v1668_v63 = vmul.f32 0.7978846, %v1660_v55  ;;  %3930 = vtanh.f32 %v1667_v56 }
 0x3c0   : > { %3932 = vtanh.f32 %v1670_v58  ;;  %v1657_v2 = vmul.f32 %v1649_v59, %v5003_v40  ;;  %v1650_v3 = vmul.f32 %v1642_v60, %v1634_v51  ;;  %v1681_v20 = vmul.f32 0.5, %v5003_v40  ;;  %v3840_v58 = vld [vmem:[#allocation13] sm:$0xff]   ;;  %v3841_v59 = vld [vmem:[#allocation13 + $0x8] sm:$0xff]   ;;  %v3846_v60 = vld [vmem:[#allocation13 + $0x30] sm:$0xff]  }
 0x3c1   : > { %v1655_v4 = vmul.f32 %v1647_v61, %v5007_v44  ;;  %v1648_v5 = vmul.f32 %v1640_v62, %v1632_v54  ;;  %3934 = vtanh.f32 %v1668_v63  ;;  %v1682_v1 = vmul.f32 0.5, %v1634_v51  ;;  %3570 = vmatprep.subr.bf16.mxu1 %v3840_v58  ;;  %v3847_v61 = vld [vmem:[#allocation13 + $0x38] sm:$0xff]   ;;  %v3249_v62 = vld [vmem:[%s5392_s19] ss:$0 sm:$0xff] }
 0x3c2   : > { %v1658_v7 = vmul.f32 %v1650_v3, %v1634_v51  ;;  %v1665_v34 = vadd.f32 %v1657_v2, %v5003_v40  ;;  %v1679_v24 = vmul.f32 0.5, %v5007_v44  ;;  %v1680_v47 = vmul.f32 0.5, %v1632_v54  ;;  %v3842_v40 = vld [vmem:[#allocation13 + $0x10] sm:$0xff]  }
 0x3c3   : > { %v1656_v8 = vmul.f32 %v1648_v5, %v1632_v54  ;;  %v1663_v10 = vadd.f32 %v1655_v4, %v5007_v44  ;;  %v3843_v44 = vld [vmem:[#allocation13 + $0x18] sm:$0xff]  }
 0x3c4   : > { %v1666_v11 = vadd.f32 %v1658_v7, %v1634_v51  ;;  %v1673_v12 = vmul.f32 0.7978846, %v1665_v34  ;;  %v3844_v51 = vld [vmem:[#allocation13 + $0x20] sm:$0xff]  }
 0x3c5   : > { %v1664_v13 = vadd.f32 %v1656_v8, %v1632_v54  ;;  %v1671_v14 = vmul.f32 0.7978846, %v1663_v10  ;;  %v3845_v54 = vld [vmem:[#allocation13 + $0x28] sm:$0xff]  }
 0x3c6   : > { %v1674_v16 = vmul.f32 0.7978846, %v1666_v11  ;;  %3936 = vtanh.f32 %v1673_v12 }
 0x3c7   : > { %v1672_v17 = vmul.f32 0.7978846, %v1664_v13  ;;  %3938 = vtanh.f32 %v1671_v14 }
 0x3c8   : > { %v3929_v18 = vpop.eup %3928  ;;  %3940 = vtanh.f32 %v1674_v16 }
 0x3c9   : > { %v3931_v19 = vpop.eup %3930  ;;  %v1693_v21 = vadd.f32 1.0, %v3929_v18  ;;  %3942 = vtanh.f32 %v1672_v17 }
 0x3ca   : > { %v3933_v22 = vpop.eup %3932  ;;  %v1691_v23 = vadd.f32 1.0, %v3931_v19 }
 0x3cb   : > { %v3935_v25 = vpop.eup %3934  ;;  %v1694_v28 = vadd.f32 1.0, %v3933_v22  ;;  %v1701_v32 = vmul.f32 %v1693_v21, %v1677_v26 }
 0x3cc   : > { %v1692_v31 = vadd.f32 1.0, %v3935_v25  ;;  %v1699_v35 = vmul.f32 %v1691_v23, %v1675_v29 }
 0x3cd   : > { %v1702_v33 = vmul.f32 %v1694_v28, %v1678_v27 }
 0x3ce   : > { %v1700_v36 = vmul.f32 %v1692_v31, %v1676_v30 }
 0x3cf   : > { %v1708_v37 = vpack.c.bf16 %v1702_v33, %v1701_v32 }
 0x3d0   : > { %v3937_v38 = vpop.eup %3936  ;;  %v1707_v39 = vpack.c.bf16 %v1700_v36, %v1699_v35 }
 0x3d1   : > { %v3939_v41 = vpop.eup %3938  ;;  %v1697_v42 = vadd.f32 1.0, %v3937_v38 }
 0x3d2   : > { %v3941_v43 = vpop.eup %3940  ;;  %3562 = vmatprep.mubr.bf16.mxu1 %v1707_v39  ;;  %v1695_v15 = vadd.f32 1.0, %v3939_v41 }
 0x3d3   : > { %v3943_v45 = vpop.eup %3942  ;;  %3563 = vmatmul.mubr.bf16.vlgmr.msra.gmra.mrb[4].mxu1 %v1708_v37  ;;  %v1698_v46 = vadd.f32 1.0, %v3941_v43  ;;  %v1705_v49 = vmul.f32 %v1697_v42, %v1681_v20 }
 0x3d4   : > { %v1696_v48 = vadd.f32 1.0, %v3943_v45  ;;  %v1703_v52 = vmul.f32 %v1695_v15, %v1679_v24  ;;  %3571 = vmatpush3.bf16.msra.mxu1 %v3840_v58 }
 0x3d5   : > { %v1706_v50 = vmul.f32 %v1698_v46, %v1682_v1  ;;  %3572 = vmatprep.subr.bf16.mxu1 %v3841_v59 }
 0x3d6   : > { %v1704_v53 = vmul.f32 %v1696_v48, %v1680_v47 }
 0x3d7   : > { %v1710_v55 = vpack.c.bf16 %v1706_v50, %v1705_v49 }
 0x3d8   : > { %v1709_v56 = vpack.c.bf16 %v1704_v53, %v1703_v52  ;;  %3573 = vmatpush3.bf16.msra.mxu1 %v3841_v59 }
 0x3d9   : > { %3574 = vmatprep.subr.bf16.mxu1 %v3842_v40 }
 0x3da   : > { %3566 = vmatprep.mubr.bf16.mxu1 %v1709_v56 }
 0x3db   : > { %3567 = vmatmul.mubr.bf16.gmra.mrb[8].mxu1 %v1710_v55 }
 0x3dc   : > { %3575 = vmatpush3.bf16.msra.mxu1 %v3842_v40 }
 0x3dd   : > { %3576 = vmatprep.subr.bf16.mxu1 %v3843_v44 }
 0x3e0   : > { %3577 = vmatpush3.bf16.msra.mxu1 %v3843_v44 }
 0x3e1   : > { %3578 = vmatprep.subr.bf16.mxu1 %v3844_v51 }
 0x3e4   : > { %3579 = vmatpush3.bf16.msra.mxu1 %v3844_v51 }
 0x3e5   : > { %3580 = vmatprep.subr.bf16.mxu1 %v3845_v54 }
 0x3e8   : > { %3581 = vmatpush3.bf16.msra.mxu1 %v3845_v54 }
 0x3e9   : > { %3582 = vmatprep.subr.bf16.mxu1 %v3846_v60 }
 0x3ec   : > { %3583 = vmatpush3.bf16.msra.mxu1 %v3846_v60 }
 0x3ed   : > { %3584 = vmatprep.subr.bf16.mxu1 %v3847_v61 }
 0x3f0   : > { %3585 = vmatpush3.bf16.msra.mxu1 %v3847_v61 }
 0x4a6   : > { %v3564_v63 = vpop.f32.mrb[4].mxu1 }
 0x4a7   : > { %v5030_v2 = vadd.f32 %v3564_v63, %v3249_v62  ;;  %v1816_v3 = vpop.f32.mrb[5].mxu1 }
 0x4a8   : > { %v5032_v4 = vadd.f32 %v3249_v62, %v1816_v3  ;;  %v3565_v5 = vpop.f32.mrb[6].mxu1 }
 0x4a9   : > { %v1849_v7 = vmul.f32 0.044715, %v5030_v2  ;;  %v5035_v34 = vadd.f32 %v3565_v5, %v3249_v62  ;;  %v1819_v8 = vpop.f32.mrb[7].mxu1  ;;  %v1889_v5 = vmul.f32 0.5, %v5030_v2 }
 0x4aa   : > { %v1847_v10 = vmul.f32 0.044715, %v5032_v4  ;;  %v5038_v11 = vadd.f32 %v3249_v62, %v1819_v8 }
 0x4ab   : > { %v1857_v12 = vmul.f32 %v1849_v7, %v5030_v2  ;;  %v1850_v13 = vmul.f32 0.044715, %v5035_v34  ;;  %v1890_v7 = vmul.f32 0.5, %v5035_v34 }
 0x4ac   : > { %v1855_v14 = vmul.f32 %v1847_v10, %v5032_v4  ;;  %v1848_v16 = vmul.f32 0.044715, %v5038_v11  ;;  %v1887_v10 = vmul.f32 0.5, %v5032_v4 }
 0x4ad   : > { %v1865_v17 = vmul.f32 %v1857_v12, %v5030_v2  ;;  %v1858_v18 = vmul.f32 %v1850_v13, %v5035_v34  ;;  %v1888_v12 = vmul.f32 0.5, %v5038_v11 }
 0x4ae   : > { %v1863_v19 = vmul.f32 %v1855_v14, %v5032_v4  ;;  %v1856_v21 = vmul.f32 %v1848_v16, %v5038_v11  ;;  %v3568_v22 = vpop.f32.mrb[8].mxu1 }
 0x4af   : > { %v1873_v23 = vadd.f32 %v1865_v17, %v5030_v2  ;;  %v1866_v25 = vmul.f32 %v1858_v18, %v5035_v34  ;;  %v5050_v26 = vadd.f32 %v3568_v22, %v3249_v62  ;;  %v1832_v27 = vpop.f32.mrb[9].mxu1 }
 0x4b0   : > { %v1864_v28 = vmul.f32 %v1856_v21, %v5038_v11  ;;  %v5053_v29 = vadd.f32 %v3249_v62, %v1832_v27  ;;  %v3569_v30 = vpop.f32.mrb[10].mxu1  ;;  %v1871_v31 = vadd.f32 %v1863_v19, %v5032_v4 }
 0x4b1   : > { %v1881_v32 = vmul.f32 0.7978846, %v1873_v23  ;;  %v1874_v33 = vadd.f32 %v1866_v25, %v5035_v34  ;;  %v1853_v35 = vmul.f32 0.044715, %v5050_v26  ;;  %v1844_v36 = vadd.f32 %v3569_v30, %v3249_v62  ;;  %v1835_v37 = vpop.f32.mrb[11].mxu1 }
 0x4b2   : > { %v1851_v38 = vmul.f32 0.044715, %v5053_v29  ;;  %v1836_v39 = vadd.f32 %v3249_v62, %v1835_v37  ;;  %v1872_v41 = vadd.f32 %v1864_v28, %v5038_v11  ;;  %v1879_v42 = vmul.f32 0.7978846, %v1871_v31 }
 0x4b3   : > { %3944 = vtanh.f32 %v1881_v32  ;;  %v1882_v43 = vmul.f32 0.7978846, %v1874_v33  ;;  %v1861_v15 = vmul.f32 %v1853_v35, %v5050_v26  ;;  %v1854_v45 = vmul.f32 0.044715, %v1844_v36 }
 0x4b4   : > { %v1859_v20 = vmul.f32 %v1851_v38, %v5053_v29  ;;  %v1852_v1 = vmul.f32 0.044715, %v1836_v39  ;;  %v1880_v46 = vmul.f32 0.7978846, %v1872_v41  ;;  %3946 = vtanh.f32 %v1879_v42 }
 0x4b5   : > { %3948 = vtanh.f32 %v1882_v43  ;;  %v1869_v24 = vmul.f32 %v1861_v15, %v5050_v26  ;;  %v1862_v47 = vmul.f32 %v1854_v45, %v1844_v36  ;;  %v1893_v34 = vmul.f32 0.5, %v5050_v26  ;;  %v3795_v43 = vpop.permute.xlu1 %3794 }
 0x4b6   : > { %v1867_v48 = vmul.f32 %v1859_v20, %v5053_v29  ;;  %v1860_v49 = vmul.f32 %v1852_v1, %v1836_v39  ;;  %3950 = vtanh.f32 %v1880_v46  ;;  %v1894_v4 = vmul.f32 0.5, %v1844_v36 }
 0x4b7   : > { %v1870_v50 = vmul.f32 %v1862_v47, %v1844_v36  ;;  %v1877_v52 = vadd.f32 %v1869_v24, %v5050_v26  ;;  %v1891_v11 = vmul.f32 0.5, %v5053_v29  ;;  %v1892_v31 = vmul.f32 0.5, %v1836_v39  ;;  %v3258_v26 = vld [vmem:[%s5393_s25] ss:$0 sm:$0xff]  ;;  %s5403_s25 = sld [smem:[#allocation52_spill]] }
 0x4b8   : > { %v1868_v53 = vmul.f32 %v1860_v49, %v1836_v39  ;;  %v1875_v55 = vadd.f32 %v1867_v48, %v5053_v29  ;;  %v3796_v29 = vunpack.i.l.bf16 %v3795_v43  ;;  %v3797_v24 = vunpack.i.h.bf16 %v3795_v43 }
 0x4b9   : > { %v1878_v56 = vadd.f32 %v1870_v50, %v1844_v36  ;;  %v1885_v58 = vmul.f32 0.7978846, %v1877_v52  ;;  %v3790_v36 = vpop.permute.xlu0 %3789 }
 0x4ba   : > { %v1876_v59 = vadd.f32 %v1868_v53, %v1836_v39  ;;  %v1883_v40 = vmul.f32 0.7978846, %v1875_v55  ;;  %v3791_v20 = vunpack.i.l.bf16 %v3790_v36  ;;  %v3792_v50 = vunpack.i.h.bf16 %v3790_v36  ;;  %v3805_v53 = vpop.permute.xlu1 %3804 }
 0x4bb   : > { %v1886_v44 = vmul.f32 0.7978846, %v1878_v56  ;;  %3952 = vtanh.f32 %v1885_v58 }
 0x4bc   : > { %v1884_v51 = vmul.f32 0.7978846, %v1876_v59  ;;  %3954 = vtanh.f32 %v1883_v40 }
 0x4bd   : > { %v3945_v54 = vpop.eup %3944  ;;  %3956 = vtanh.f32 %v1886_v44  ;;  %v3800_v58 = vpop.permute.xlu0 %3799 }
 0x4be   : > { %v3947_v60 = vpop.eup %3946  ;;  %v1905_v61 = vadd.f32 1.0, %v3945_v54  ;;  %3958 = vtanh.f32 %v1884_v51  ;;  %v3807_v54 = vunpack.i.h.bf16 %v3805_v53 }
 0x4bf   : > { %v3949_v62 = vpop.eup %3948  ;;  %v1903_v63 = vadd.f32 1.0, %v3947_v60  ;;  %v3806_v60 = vunpack.i.l.bf16 %v3805_v53 }
 0x4c0   : > { %v3951_v3 = vpop.eup %3950  ;;  %v1906_v8 = vadd.f32 1.0, %v3949_v62  ;;  %v1913_v14 = vmul.f32 %v1905_v61, %v1889_v5 }
 0x4c1   : > { %v1904_v13 = vadd.f32 1.0, %v3951_v3  ;;  %v1911_v17 = vmul.f32 %v1903_v63, %v1887_v10  ;;  %v3802_v3 = vunpack.i.h.bf16 %v3800_v58 }
 0x4c2   : > { %v1914_v16 = vmul.f32 %v1906_v8, %v1890_v7 }
 0x4c3   : > { %v1912_v18 = vmul.f32 %v1904_v13, %v1888_v12  ;;  %v3801_v12 = vunpack.i.l.bf16 %v3800_v58 }
 0x4c4   : > { %v1920_v19 = vpack.c.bf16 %v1914_v16, %v1913_v14 }
 0x4c5   : > { %v3953_v21 = vpop.eup %3952  ;;  %v1919_v22 = vpack.c.bf16 %v1912_v18, %v1911_v17 }
 0x4c6   : > { %v3955_v23 = vpop.eup %3954  ;;  %v1909_v25 = vadd.f32 1.0, %v3953_v21 }
 0x4c7   : > { %v3957_v27 = vpop.eup %3956  ;;  %3586 = vmatprep.mubr.bf16.mxu1 %v1919_v22  ;;  %v1907_v2 = vadd.f32 1.0, %v3955_v23 }
 0x4c8   : > { %v3959_v28 = vpop.eup %3958  ;;  %3587 = vmatmul.mubr.bf16.vlgmr.msra.gmra.mrb[12].mxu1 %v1920_v19  ;;  %v1910_v30 = vadd.f32 1.0, %v3957_v27  ;;  %v1917_v33 = vmul.f32 %v1909_v25, %v1893_v34 }
 0x4c9   : > { %v1908_v32 = vadd.f32 1.0, %v3959_v28  ;;  %v1915_v37 = vmul.f32 %v1907_v2, %v1891_v11 }
 0x4ca   : > { %v1918_v35 = vmul.f32 %v1910_v30, %v1894_v4 }
 0x4cb   : > { %v1916_v38 = vmul.f32 %v1908_v32, %v1892_v31 }
 0x4cc   : > { %v1922_v41 = vpack.c.bf16 %v1918_v35, %v1917_v33 }
 0x4cd   : > { %v1921_v42 = vpack.c.bf16 %v1916_v38, %v1915_v37 }
 0x4cf   : > { %3590 = vmatprep.mubr.bf16.mxu1 %v1921_v42 }
 0x4d0   : > { %3591 = vmatmul.mubr.bf16.gmra.mrb[16].mxu1 %v1922_v41 }
 0x4d1   : > { %2503 = vmatprep.mubr.bf16.mxu1 %v4356_v0 }
 0x59b   : > { %v3588_v15 = vpop.f32.mrb[12].mxu1 }
 0x59c   : > { %v2037_v39 = vadd.f32 %v3588_v15, %v3258_v26  ;;  %v2028_v45 = vpop.f32.mrb[13].mxu1 }
 0x59d   : > { %v2029_v1 = vadd.f32 %v3258_v26, %v2028_v45  ;;  %v3589_v46 = vpop.f32.mrb[14].mxu1 }
 0x59e   : > { %v2101_v47 = vmul.f32 %v3796_v29, %v2037_v39  ;;  %v2040_v48 = vadd.f32 %v3589_v46, %v3258_v26  ;;  %v2031_v49 = vpop.f32.mrb[15].mxu1 }
 0x59f   : > { %v2099_v52 = vmul.f32 %v3791_v20, %v2029_v1  ;;  %v2032_v0 = vadd.f32 %v3258_v26, %v2031_v49 }
 0x5a0   : > { %v2119_v55 = vrot.slane %v2101_v47, 4  ;;  %v2102_v56 = vmul.f32 %v3797_v24, %v2040_v48 }
 0x5a1   : > { %v2107_v59 = vrot.slane %v2099_v52, 4  ;;  %v2100_v40 = vmul.f32 %v3792_v50, %v2032_v0 }
 0x5a2   : > { %v2120_v44 = vadd.f32 %v2119_v55, %v2101_v47  ;;  %v2125_v51 = vrot.slane %v2102_v56, 4 }
 0x5a3   : > { %v2108_v61 = vadd.f32 %v2107_v59, %v2099_v52  ;;  %v2113_v62 = vrot.slane %v2100_v40, 4  ;;  %v3592_v63 = vpop.f32.mrb[16].mxu1 }
 0x5a4   : > { %v2121_v5 = vrot.slane %v2120_v44, 2  ;;  %v2126_v7 = vadd.f32 %v2125_v51, %v2102_v56  ;;  %v2053_v8 = vadd.f32 %v3592_v63, %v3258_v26  ;;  %v2044_v10 = vpop.f32.mrb[17].mxu1 }
 0x5a5   : > { %v2109_v13 = vrot.slane %v2108_v61, 2  ;;  %v2114_v14 = vadd.f32 %v2113_v62, %v2100_v40  ;;  %v2045_v16 = vadd.f32 %v3258_v26, %v2044_v10  ;;  %v3593_v17 = vpop.f32.mrb[18].mxu1 }
 0x5a6   : > { %v2122_v18 = vadd.f32 %v2121_v5, %v2120_v44  ;;  %v2127_v19 = vrot.slane %v2126_v7, 2  ;;  %v2105_v21 = vmul.f32 %v3806_v60, %v2053_v8  ;;  %v2056_v22 = vadd.f32 %v3593_v17, %v3258_v26  ;;  %v2047_v23 = vpop.f32.mrb[19].mxu1 }
 0x5a7   : > { %v2110_v25 = vadd.f32 %v2109_v13, %v2108_v61  ;;  %v2115_v27 = vrot.slane %v2114_v14, 2  ;;  %v2103_v2 = vmul.f32 %v3801_v12, %v2045_v16  ;;  %v2048_v28 = vadd.f32 %v3258_v26, %v2047_v23  ;;  %v3859_v23 = vld [vmem:[%s5394_s18 + $0x2c] ss:$16 sps:$4 sm:$0xff]  }
 0x5a8   : > { %v2123_v34 = vrot.slane %v2122_v18, 1  ;;  %v2128_v4 = vadd.f32 %v2127_v19, %v2126_v7  ;;  %v2143_v30 = vrot.slane %v2105_v21, 4  ;;  %v2106_v11 = vmul.f32 %v3807_v54, %v2056_v22  ;;  %v3850_v19 = vld [vmem:[%s5394_s18 + $0x4] ss:$16 sps:$4 sm:$0xff]   ;;  %v3853_v22 = vld [vmem:[%s5394_s18 + $0xc] ss:$16 sps:$4 sm:$0xff]  }
 0x5a9   : > { %v2111_v31 = vrot.slane %v2110_v25, 1  ;;  %v2116_v32 = vadd.f32 %v2115_v27, %v2114_v14  ;;  %v2131_v33 = vrot.slane %v2103_v2, 4  ;;  %v2104_v35 = vmul.f32 %v3802_v3, %v2048_v28  ;;  %2430 = vmatprep.subr.bf16.mxu0 %v3850_v19  ;;  %2471 = vmatprep.subr.bf16.mxu1 %v3853_v22  ;;  %v3857_v27 = vld [vmem:[%s5394_s18 + $0x28] ss:$16 sps:$4 sm:$0xff]   ;;  %v3865_v28 = vld [vmem:[%s5394_s18 + $0x4c] ss:$16 sps:$4 sm:$0xff]  }
 0x5aa   : > { %v2129_v37 = vrot.slane %v2128_v4, 1  ;;  %v2144_v38 = vadd.f32 %v2143_v30, %v2105_v21  ;;  %v2149_v41 = vrot.slane %v2106_v11, 4  ;;  %v2124_v29 = vadd.f32 %v2123_v34, %v2122_v18  ;;  %v3848_v18 = vld [vmem:[%s5394_s18] ss:$16 sps:$4 sm:$0xff]   ;;  %v3851_v21 = vld [vmem:[%s5394_s18 + $0x8] ss:$16 sps:$4 sm:$0xff]  }
 0x5ab   : > { %v2112_v42 = vadd.f32 %v2111_v31, %v2110_v25  ;;  %v2117_v43 = vrot.slane %v2116_v32, 1  ;;  %v2132_v36 = vadd.f32 %v2131_v33, %v2103_v2  ;;  %v2137_v15 = vrot.slane %v2104_v35, 4  ;;  %2431 = vmatpush1.bf16.msra.mxu0 %v3848_v18  ;;  %v3854_v25 = vld [vmem:[%s5394_s18 + $0x20] ss:$16 sps:$4 sm:$0xff]   ;;  %2472 = vmatpush1.bf16.msra.mxu1 %v3851_v21  ;;  %v3862_v2 = vld [vmem:[%s5394_s18 + $0x44] ss:$16 sps:$4 sm:$0xff]  }
 0x5ac   : > { %v2145_v39 = vrot.slane %v2144_v38, 2  ;;  %v2150_v45 = vadd.f32 %v2149_v41, %v2106_v11  ;;  %v2130_v20 = vadd.f32 %v2129_v37, %v2128_v4  ;;  %v2157_v0 = vmul.f32 0.033333335, %v2124_v29  ;;  %2473 = vmatprep.subr.bf16.mxu1 %v3859_v23  ;;  %v3860_v34 = vld [vmem:[%s5394_s18 + $0x40] ss:$16 sps:$4 sm:$0xff]   ;;  %v3911_v18 = vld [vmem:[#allocation14 + $0x98] sm:$0xff]  }
 0x5ad   : > { %v2118_v26 = vadd.f32 %v2117_v43, %v2116_v32  ;;  %v2133_v1 = vrot.slane %v2132_v36, 2  ;;  %v2138_v46 = vadd.f32 %v2137_v15, %v2104_v35  ;;  %v2155_v48 = vmul.f32 0.033333335, %v2112_v42  ;;  %v3863_v4 = vld [vmem:[%s5394_s18 + $0x48] ss:$16 sps:$4 sm:$0xff]   ;;  %v1022_v33 = vld [vmem:[%s982_s23] sm:$0xff] }
 0x5ae   : > { %v2146_v24 = vadd.f32 %v2145_v39, %v2144_v38  ;;  %v2151_v47 = vrot.slane %v2150_v45, 2  ;;  %v2158_v56 = vmul.f32 0.033333335, %v2130_v20  ;;  %v3868_v35 = vld [vmem:[%s5394_s18 + $0x64] ss:$16 sps:$4 sm:$0xff]   ;;  %v3916_v23 = vld [vmem:[#allocation14 + $0x68] sm:$0xff]  }
 0x5af   : > { %v2156_v49 = vmul.f32 0.033333335, %v2118_v26  ;;  %v2134_v50 = vadd.f32 %v2133_v1, %v2132_v36  ;;  %v2139_v52 = vrot.slane %v2138_v46, 2  ;;  %2474 = vmatpush1.bf16.msra.mxu1 %v3857_v27  ;;  %v3871_v37 = vld [vmem:[%s5394_s18 + $0x6c] ss:$16 sps:$4 sm:$0xff]   ;;  %v3912_v19 = vld [vmem:[#allocation14 + $0x60] sm:$0xff]  }
 0x5b0   : > { %v2147_v53 = vrot.slane %v2146_v24, 1  ;;  %v2152_v55 = vadd.f32 %v2151_v47, %v2150_v45  ;;  %2475 = vmatprep.subr.bf16.mxu1 %v3865_v28  ;;  %v3866_v38 = vld [vmem:[%s5394_s18 + $0x60] ss:$16 sps:$4 sm:$0xff]   ;;  %v3869_v41 = vld [vmem:[%s5394_s18 + $0x68] ss:$16 sps:$4 sm:$0xff]   ;;  %s5402_s23 = sshll.u32 %s4865_s10, 3 }
 0x5b1   : > { %v2172_v58 = vsel %vm2171_vm11, %v2156_v49, %v2155_v48  ;;  %v2135_v59 = vrot.slane %v2134_v50, 1  ;;  %v2140_v40 = vadd.f32 %v2139_v52, %v2138_v46  ;;  %v3874_v42 = vld [vmem:[%s5394_s18 + $0x84] ss:$16 sps:$4 sm:$0xff]   ;;  %v3877_v43 = vld [vmem:[%s5394_s18 + $0x8c] ss:$16 sps:$4 sm:$0xff]   ;;  %s944_s19 = scalar_lea.vmem [#allocation16], %s5402_s23 }
 0x5b2   : > { %v2153_v44 = vrot.slane %v2152_v55, 1  ;;  %v2174_v51 = vsel %vm2173_vm12, %v2157_v0, %v2172_v58  ;;  %v2148_v62 = vadd.f32 %v2147_v53, %v2146_v24  ;;  %v3872_v36 = vld [vmem:[%s5394_s18 + $0x80] ss:$16 sps:$4 sm:$0xff]   ;;  %v3875_v15 = vld [vmem:[%s5394_s18 + $0x88] ss:$16 sps:$4 sm:$0xff]  }
 0x5b3   : > { %v2136_v54 = vadd.f32 %v2135_v59, %v2134_v50  ;;  %v2141_v60 = vrot.slane %v2140_v40, 1  ;;  %v2176_v61 = vsel %vm2175_vm13, %v2158_v56, %v2174_v51  ;;  %2476 = vmatpush1.bf16.msra.mxu1 %v3863_v4  ;;  %v3880_v29 = vld [vmem:[%s5394_s18 + $0xa4] ss:$16 sps:$4 sm:$0xff]   ;;  %v3883_v39 = vld [vmem:[%s5394_s18 + $0xac] ss:$16 sps:$4 sm:$0xff]  }
 0x5b4   : > { %v2154_v5 = vadd.f32 %v2153_v44, %v2152_v55  ;;  %v2161_v10 = vmul.f32 0.033333335, %v2148_v62  ;;  %2477 = vmatprep.subr.bf16.mxu1 %v3871_v37  ;;  %v3878_v45 = vld [vmem:[%s5394_s18 + $0xa0] ss:$16 sps:$4 sm:$0xff]   ;;  %v3881_v20 = vld [vmem:[%s5394_s18 + $0xa8] ss:$16 sps:$4 sm:$0xff]  }
 0x5b5   : > { %v2159_v63 = vmul.f32 0.033333335, %v2136_v54  ;;  %v2142_v3 = vadd.f32 %v2141_v60, %v2140_v40  ;;  %v3886_v26 = vld [vmem:[%s5394_s18 + $0xc4] ss:$16 sps:$4 sm:$0xff]   ;;  %v3884_v1 = vld [vmem:[%s5394_s18 + $0xc0] ss:$16 sps:$4 sm:$0xff]  }
 0x5b6   : > { %v2162_v12 = vmul.f32 0.033333335, %v2154_v5  ;;  %v3887_v46 = vld [vmem:[%s5394_s18 + $0xc8] ss:$16 sps:$4 sm:$0xff]   ;;  %v3889_v24 = vld [vmem:[%s5394_s18 + $0xcc] ss:$16 sps:$4 sm:$0xff]  }
 0x5b7   : > { %v2160_v7 = vmul.f32 0.033333335, %v2142_v3  ;;  %v2178_v8 = vsel %vm2177_vm14, %v2159_v63, %v2176_v61  ;;  %2478 = vmatpush1.bf16.msra.mxu1 %v3869_v41  ;;  %v3892_v47 = vld [vmem:[%s5394_s18 + $0xe4] ss:$16 sps:$4 sm:$0xff]   ;;  %v3895_v48 = vld [vmem:[%s5394_s18 + $0xec] ss:$16 sps:$4 sm:$0xff]  }
 0x5b8   : > { %2479 = vmatprep.subr.bf16.mxu1 %v3877_v43  ;;  %v3890_v49 = vld [vmem:[%s5394_s18 + $0xe0] ss:$16 sps:$4 sm:$0xff]   ;;  %v3893_v50 = vld [vmem:[%s5394_s18 + $0xe8] ss:$16 sps:$4 sm:$0xff]   ;;  %v2264_v41 = vsub.s32 3, %v4968_v57 }
 0x5b9   : > { %v2180_v13 = vsel %vm2179_vm15, %v2160_v7, %v2178_v8  ;;  %v3267_v56 = vld [vmem:[%s5396_s7] ss:$0 sm:$0xff]  ;;  %v3900_v63 = vld [vmem:[#allocation14 + $0x48] sm:$0xff]   ;;  %v3904_v8 = vld [vmem:[#allocation14 + $0x50] sm:$0xff]  }
 0x5ba   : > { %v2182_v14 = vsel %vm2181_vm0, %v2161_v10, %v2180_v13  ;;  %v3268_v59 = vld [vmem:[%s5397_s16] ss:$0 sm:$0xff]  ;;  %v3901_v3 = vld [vmem:[#allocation14 + $0xc8] sm:$0xff]   ;;  %v3905_v10 = vld [vmem:[#allocation14 + $0xd0] sm:$0xff]   ;;  %s3337_s16 = sshll.u32 %s2942_s3, 7 }
 0x5bb   : > { %v2184_v16 = vsel %vm2183_vm1, %v2162_v12, %v2182_v14  ;;  %2480 = vmatpush1.bf16.msra.mxu1 %v3875_v15  ;;  %v3896_v54 = vld [vmem:[#allocation14 + $0x40] sm:$0xff]   ;;  %v3902_v5 = vld [vmem:[#allocation14 + $0x8] sm:$0xff]   ;;  %v3906_v12 = vld [vmem:[#allocation14 + $0x10] sm:$0xff]  }
 0x5bc   : > { %v2186_v17 = vadd.f32 %v2184_v16, %v4947_v9  ;;  %v3856_v9 = vld [vmem:[%s5394_s18 + $0x24] ss:$16 sps:$4 sm:$0xff]   ;;  %2481 = vmatprep.subr.bf16.mxu1 %v3883_v39  ;;  %v3903_v7 = vld [vmem:[#allocation14 + $0x88] sm:$0xff]   ;;  %v3908_v14 = vld [vmem:[#allocation14 + $0x58] sm:$0xff]  }
 0x5bd   : > { %2432 = vmatprep.subr.bf16.mxu0 %v3856_v9  ;;  %v3897_v60 = vld [vmem:[#allocation14 + $0xc0] sm:$0xff]   ;;  %v3907_v13 = vld [vmem:[#allocation14 + $0x90] sm:$0xff]   ;;  %v3909_v16 = vld [vmem:[#allocation14 + $0xd8] sm:$0xff]  }
 0x5be   : > { %2189 = vadd.xlane.f32.xlu0 %v2186_v17  ;;  %2433 = vmatpush1.bf16.msra.mxu0 %v3854_v25  ;;  %v3898_v61 = vld [vmem:[#allocation14] sm:$0xff]   ;;  %v3917_v25 = vld [vmem:[#allocation14 + $0xe8] sm:$0xff]   ;;  %v3920_v28 = vld [vmem:[#allocation14 + $0x70] sm:$0xff]  }
 0x5bf   : > { %2434 = vmatprep.subr.bf16.mxu0 %v3862_v2  ;;  %2482 = vmatpush1.bf16.msra.mxu1 %v3881_v20  ;;  %v3899_v62 = vld [vmem:[#allocation14 + $0x80] sm:$0xff]   ;;  %v3918_v27 = vld [vmem:[#allocation14 + $0x28] sm:$0xff]   ;;  %v3922_v4 = vld [vmem:[#allocation14 + $0x30] sm:$0xff]  }
 0x5c0   : > { %2483 = vmatprep.subr.bf16.mxu1 %v3889_v24  ;;  %v3913_v21 = vld [vmem:[#allocation14 + $0xe0] sm:$0xff]   ;;  %v3919_v2 = vld [vmem:[#allocation14 + $0xa8] sm:$0xff]  }
 0x5c1   : > { %v3914_v22 = vld [vmem:[#allocation14 + $0x20] sm:$0xff]  }
 0x5c2   : > { %2435 = vmatpush1.bf16.msra.mxu0 %v3860_v34  ;;  %v3915_v9 = vld [vmem:[#allocation14 + $0xa0] sm:$0xff]   ;;  %v3921_v34 = vld [vmem:[#allocation14 + $0xf0] sm:$0xff]  }
 0x5c3   : > { %2436 = vmatprep.subr.bf16.mxu0 %v3868_v35  ;;  %2484 = vmatpush1.bf16.msra.mxu1 %v3887_v46  ;;  %v2260_v35 = vsub.s32 2, %v4968_v57  ;;  %v2248_v37 = vld [vmem:[%s5398_s21] sm:$0xf]  ;;  %s2946_s21 = sshll.u32 %s944_s19, 4  ;;  %s5215_s21 = int_to_ptr.vmem [resolvable:$true] %s2946_s21 }
 0x5c4   : > { %2485 = vmatprep.subr.bf16.mxu1 %v3895_v48  ;;  %v2265_v15 = vrot.slane %v2248_v37, %v2264_v41  ;;  %s4200_s12 = scalar_lea.vmem %s5215_s21, 128  ;;  %p4207_p1 = scmp.lt.s32.totalorder %s5215_s21, %s4205_s13 }
 0x5c5   : > { %v2261_v43 = vrot.slane %v2248_v37, %v2260_v35  ;;  %p4201_p9 = scmp.ne.s32.totalorder %s5215_s21, %s4200_s12 }
 0x5c6   : > { %2437 = vmatpush1.bf16.msra.mxu0 %v3866_v38  ;;  %v2256_v38 = vsub.s32 1, %v4968_v57 }
 0x5c7   : > { %2438 = vmatprep.subr.bf16.mxu0 %v3874_v42  ;;  %2486 = vmatpush1.bf16.msra.mxu1 %v3893_v50  ;;  %v2253_v42 = vrot.slane %v2248_v37, %v4975_v6  ;;  %p4202_p2 = pnand %p4201_p9, %p5404_p4 }
 0x5c8   : > { %3444 = vmatprep.subr.bf16.mxu1 %v3897_v60 }
 0x5c9   : > { %p4203_p5 = pneg %p4202_p2 }
 0x5ca   : > { %2439 = vmatpush1.bf16.msra.mxu0 %v3872_v36  ;;  %v2257_v36 = vrot.slane %v2248_v37, %v2256_v38 }
 0x5cb   : > { %2440 = vmatprep.subr.bf16.mxu0 %v3880_v29 }
 0x5ce   : > { %2441 = vmatpush1.bf16.msra.mxu0 %v3878_v45 }
 0x5cf   : > { %2442 = vmatprep.subr.bf16.mxu0 %v3886_v26 }
 0x5d2   : > { %2443 = vmatpush1.bf16.msra.mxu0 %v3884_v1 }
 0x5d3   : > { %2444 = vmatprep.subr.bf16.mxu0 %v3892_v47 }
 0x5d6   : > { %2445 = vmatpush1.bf16.msra.mxu0 %v3890_v49 }
 0x5d7   : > { %3422 = vmatprep.subr.bf16.mxu0 %v3896_v54 }
 0x64b   : > { %v2190_v30 = vpop.xlane.xlu0 %2189 }
 0x64c   : > { %v2192_v11 = vmul.f32 0.0078125, %v2190_v30  ;;  %v3923_v30 = vld [vmem:[#allocation14 + $0xb0] sm:$0xff]  }
 0x64e   : > { %v2193_v31 = vsub.f32 %v2186_v17, %v2192_v11  ;;  %v3910_v17 = vld [vmem:[#allocation14 + $0x18] sm:$0xff]  }
 0x64f   : > { %v3924_v11 = vld [vmem:[#allocation14 + $0x78] sm:$0xff]  }
 0x650   : > { %v2194_v32 = vmul.f32 %v2193_v31, %v2193_v31 }
 0x652   : > { %2195 = vadd.xlane.f32.xlu1 %v2194_v32  ;;  %v3926_v32 = vld [vmem:[#allocation14 + $0x38] sm:$0xff]  }
 0x663   : > { %2925 = vperm.xlu1 %3787, %v1022_v33   ;;  %v3927_v33 = vld [vmem:[#allocation14 + $0xb8] sm:$0xff]  }
 0x6df   : > { %v2196_v52 = vpop.xlane.xlu1 %2195 }
 0x6e0   : > { %v2197_v0 = vmul.f32 0.0078125, %v2196_v52 }
 0x6e2   : > { %v2198_v53 = vadd.f32 1e-05, %v2197_v0 }
 0x6e4   : > { %3960 = vrsqrt.f32 %v2198_v53 }
 0x6ee   : > { %v3961_v55 = vpop.eup %3960 }
 0x6ef   : > { %v2200_v58 = vmul.f32 %v3961_v55, %v2193_v31  ;;  %v3925_v31 = vld [vmem:[#allocation14 + $0xf8] sm:$0xff]  }
 0x6f1   : > { %v2207_v40 = vmul.f32 %v3267_v56, %v2200_v58 }
 0x6f3   : > { %v5185_v44 = vadd.f32 %v3268_v59, %v2207_v40 }
 0x6f5   : > { %v2215_v51 = vpack.c.bf16 %v5185_v44, %v5185_v44 }
 0x6f7   : > { %2463 = vmatmul.mubr.bf16.vlgmr.msra.gmra.mrb[16].mxu0 %v2215_v51  ;;  %2504 = vmatmul.mubr.bf16.vlgmr.msra.gmra.mrb[20].mxu1 %v2215_v51 }
 0x6f8   : > { %3423 = vmatpush3.bf16.msra.mxu0 %v3898_v61  ;;  %3445 = vmatpush3.bf16.msra.mxu1 %v3899_v62 }
 0x6f9   : > { %3424 = vmatprep.subr.bf16.mxu0 %v3900_v63  ;;  %3446 = vmatprep.subr.bf16.mxu1 %v3901_v3 }
 0x6fc   : > { %3425 = vmatpush3.bf16.msra.mxu0 %v3902_v5  ;;  %3447 = vmatpush3.bf16.msra.mxu1 %v3903_v7 }
 0x6fd   : > { %3426 = vmatprep.subr.bf16.mxu0 %v3904_v8  ;;  %3448 = vmatprep.subr.bf16.mxu1 %v3905_v10 }
 0x700   : > { %3427 = vmatpush3.bf16.msra.mxu0 %v3906_v12  ;;  %3449 = vmatpush3.bf16.msra.mxu1 %v3907_v13 }
 0x701   : > { %3428 = vmatprep.subr.bf16.mxu0 %v3908_v14  ;;  %3450 = vmatprep.subr.bf16.mxu1 %v3909_v16 }
 0x704   : > { %3429 = vmatpush3.bf16.msra.mxu0 %v3910_v17  ;;  %3451 = vmatpush3.bf16.msra.mxu1 %v3911_v18 }
 0x705   : > { %3430 = vmatprep.subr.bf16.mxu0 %v3912_v19  ;;  %3452 = vmatprep.subr.bf16.mxu1 %v3913_v21 }
 0x708   : > { %3431 = vmatpush3.bf16.msra.mxu0 %v3914_v22  ;;  %3453 = vmatpush3.bf16.msra.mxu1 %v3915_v9 }
 0x709   : > { %3432 = vmatprep.subr.bf16.mxu0 %v3916_v23  ;;  %3454 = vmatprep.subr.bf16.mxu1 %v3917_v25 }
 0x70c   : > { %3433 = vmatpush3.bf16.msra.mxu0 %v3918_v27  ;;  %3455 = vmatpush3.bf16.msra.mxu1 %v3919_v2 }
 0x70d   : > { %3434 = vmatprep.subr.bf16.mxu0 %v3920_v28  ;;  %3456 = vmatprep.subr.bf16.mxu1 %v3921_v34 }
 0x710   : > { %3435 = vmatpush3.bf16.msra.mxu0 %v3922_v4  ;;  %3457 = vmatpush3.bf16.msra.mxu1 %v3923_v30 }
 0x711   : > { %3436 = vmatprep.subr.bf16.mxu0 %v3924_v11  ;;  %3458 = vmatprep.subr.bf16.mxu1 %v3925_v31 }
 0x714   : > { %3437 = vmatpush3.bf16.msra.mxu0 %v3926_v32  ;;  %3459 = vmatpush3.bf16.msra.mxu1 %v3927_v33  ;;  %v3301_v33 = vld [vmem:[%s5399_s14] ss:$0 sm:$0xff]  ;;  %s5213_s14 = scalar_lea.hbm %s5403_s25, %s3337_s16 }
 0x7ca   : > { %v2464_v29 = vpop.f32.mrb[16].mxu0  ;;  %v2505_v39 = vpop.f32.mrb[20].mxu1 }
 0x7cb   : > { %v2465_v45 = vadd.f32 %v2464_v29, %v2253_v42  ;;  %v2506_v20 = vadd.f32 %v2505_v39, %v2261_v43  ;;  %v2466_v26 = vpop.f32.mrb[17].mxu0  ;;  %v2507_v1 = vpop.f32.mrb[21].mxu1 }
 0x7cc   : > { %v2467_v46 = vadd.f32 %v2466_v26, %v2257_v36  ;;  %v2508_v24 = vadd.f32 %v2507_v1, %v2265_v15  ;;  %v2468_v47 = vpop.f32.mrb[18].mxu0  ;;  %v2509_v48 = vpop.f32.mrb[22].mxu1 }
 0x7cd   : > { %v2512_v49 = vmul.f32 0.044715, %v2465_v45  ;;  %v2514_v50 = vmul.f32 0.044715, %v2506_v20  ;;  %v2469_v52 = vpop.f32.mrb[19].mxu0  ;;  %v2510_v0 = vpop.f32.mrb[23].mxu1 }
 0x7ce   : > { %v2513_v57 = vmul.f32 0.044715, %v2467_v46  ;;  %v2515_v53 = vmul.f32 0.044715, %v2508_v24  ;;  %v2532_v13 = vmul.f32 0.5, %v2465_v45  ;;  %v2533_v17 = vmul.f32 0.5, %v2467_v46 }
 0x7cf   : > { %v2516_v6 = vmul.f32 %v2512_v49, %v2465_v45  ;;  %v2518_v55 = vmul.f32 %v2514_v50, %v2506_v20  ;;  %v2535_v21 = vmul.f32 0.5, %v2508_v24  ;;  %v2534_v25 = vmul.f32 0.5, %v2506_v20  ;;  %v3334_v50 = vld [vmem:[%s5400_s8] ss:$0 sm:$0xff]  ;;  %s4206_s8 = scalar_lea.vmem %s4205_s13, 256 }
 0x7d0   : > { %v2517_v56 = vmul.f32 %v2513_v57, %v2467_v46  ;;  %v2519_v58 = vmul.f32 %v2515_v53, %v2508_v24  ;;  %v2926_v53 = vpop.permute.xlu1 %2925  ;;  %p4208_p6 = scmp.lt.s32.totalorder %s4206_s8, %s4200_s12 }
 0x7d1   : > { %v2520_v59 = vmul.f32 %v2516_v6, %v2465_v45  ;;  %v2522_v40 = vmul.f32 %v2518_v55, %v2506_v20 }
 0x7d2   : > { %v2521_v51 = vmul.f32 %v2517_v56, %v2467_v46  ;;  %v2523_v54 = vmul.f32 %v2519_v58, %v2508_v24  ;;  %p4209_p10 = por %p4208_p6, %p4207_p1 }
 0x7d3   : > { %v2524_v60 = vadd.f32 %v2520_v59, %v2465_v45  ;;  %v2526_v61 = vadd.f32 %v2522_v40, %v2506_v20 }
 0x7d4   : > { %v2525_v62 = vadd.f32 %v2521_v51, %v2467_v46  ;;  %v2527_v63 = vadd.f32 %v2523_v54, %v2508_v24  ;;  %p4210_p3 = pnand %p4209_p10, %p4203_p5 }
 0x7d5   : > { %v2528_v3 = vmul.f32 0.7978846, %v2524_v60  ;;  %v2530_v8 = vmul.f32 0.7978846, %v2526_v61 }
 0x7d6   : > { %v2529_v5 = vmul.f32 0.7978846, %v2525_v62  ;;  %v2531_v7 = vmul.f32 0.7978846, %v2527_v63 }
 0x7d7   : > { %3962 = vtanh.f32 %v2528_v3 }
 0x7d8   : > { %3964 = vtanh.f32 %v2529_v5 }
 0x7d9   : > { %3966 = vtanh.f32 %v2531_v7 }
 0x7da   : > { %3968 = vtanh.f32 %v2530_v8 }
 0x7e1   : > { %v3963_v10 = vpop.eup %3962 }
 0x7e2   : > { %v3965_v12 = vpop.eup %3964  ;;  %v2540_v14 = vadd.f32 1.0, %v3963_v10 }
 0x7e3   : > { %v3967_v16 = vpop.eup %3966  ;;  %v2541_v18 = vadd.f32 1.0, %v3965_v12 }
 0x7e4   : > { %v3969_v19 = vpop.eup %3968  ;;  %v2543_v22 = vadd.f32 1.0, %v3967_v16  ;;  %v2544_v9 = vmul.f32 %v2540_v14, %v2532_v13 }
 0x7e5   : > { %v2545_v23 = vmul.f32 %v2541_v18, %v2533_v17  ;;  %v2542_v27 = vadd.f32 1.0, %v3969_v19 }
 0x7e6   : > { %v2547_v2 = vmul.f32 %v2543_v22, %v2535_v21  ;;  %v2548_v30 = vpack.c.bf16 %v2544_v9, %v2544_v9 }
 0x7e7   : > { %v2549_v28 = vpack.c.bf16 %v2545_v23, %v2545_v23  ;;  %v2546_v34 = vmul.f32 %v2542_v27, %v2534_v25 }
 0x7e8   : > { %v2551_v4 = vpack.c.bf16 %v2547_v2, %v2547_v2 }
 0x7e9   : > { %2847 = vmatprep.mubr.bf16.mxu0 %v2549_v28  ;;  %v2550_v11 = vpack.c.bf16 %v2546_v34, %v2546_v34 }
 0x7ea   : > { %2887 = vmatprep.mubr.bf16.mxu1 %v2551_v4  ;;  %2848 = vmatmul.mubr.bf16.vlgmr.msra.gmra.mrb[20].mxu0 %v2548_v30 }
 0x7eb   : > { %2888 = vmatmul.mubr.bf16.vlgmr.msra.gmra.mrb[24].mxu1 %v2550_v11 }
 0x8bd   : > { %v3438_v31 = vpop.f32.mrb[20].mxu0 }
 0x8be   : > { %v3460_v32 = vpop.f32.mrb[24].mxu1  ;;  %v3439_v35 = vpop.f32.mrb[21].mxu0 }
 0x8bf   : > { %v3440_v37 = vadd.f32 %v3439_v35, %v3438_v31  ;;  %v3461_v38 = vpop.f32.mrb[25].mxu1  ;;  %v3441_v41 = vpop.f32.mrb[22].mxu0 }
 0x8c0   : > { %v3462_v42 = vadd.f32 %v3461_v38, %v3460_v32  ;;  %v3463_v43 = vpop.f32.mrb[26].mxu1  ;;  %v3442_v36 = vpop.f32.mrb[23].mxu0 }
 0x8c1   : > { %v2850_v15 = vadd.f32 %v3440_v37, %v3301_v33  ;;  %v3464_v29 = vpop.f32.mrb[27].mxu1 }
 0x8c3   : > { %v2890_v39 = vadd.f32 %v3462_v42, %v2850_v15 }
 0x8c5   : > { %v2895_v45 = vadd.f32 %v2890_v39, %v5185_v44  ;;  %v3335_v44 = vld [vmem:[%s5401_s22] ss:$0 sm:$0xff] }
 0x8c7   : > { %2898 = vadd.xlane.f32.xlu0 %v2895_v45 }
 0x954   : > { %v2899_v20 = vpop.xlane.xlu0 %2898 }
 0x955   : > { %v2900_v26 = vmul.f32 0.0078125, %v2899_v20 }
 0x957   : > { %v2901_v1 = vsub.f32 %v2895_v45, %v2900_v26 }
 0x959   : > { %v2902_v46 = vmul.f32 %v2901_v1, %v2901_v1 }
 0x95b   : > { %2903 = vadd.xlane.f32.xlu0 %v2902_v46 }
 0x9e8   : > { %v2904_v24 = vpop.xlane.xlu0 %2903 }
 0x9e9   : > { %v2905_v47 = vmul.f32 0.0078125, %v2904_v24 }
 0x9eb   : > { %v2906_v48 = vadd.f32 1e-05, %v2905_v47 }
 0x9ed   : > { %3970 = vrsqrt.f32 %v2906_v48 }
 0x9f7   : > { %v3971_v49 = vpop.eup %3970 }
 0x9f8   : > { %v2908_v52 = vmul.f32 %v3971_v49, %v2901_v1 }
 0x9fa   : > { %v2915_v0 = vmul.f32 %v3334_v50, %v2908_v52 }
 0x9fc   : > { %v2922_v57 = vadd.f32 %v3335_v44, %v2915_v0 }
 0x9fe   : > { %v2928_v6 = vmul.f32 %v2926_v53, %v2922_v57 }
 0xa00   : > { %2929 = vst [vmem:[%s944_s19] sm:$0xff] %v2928_v6 }
 0xa01   : > { %4213 = shalt.err (!%p4210_p3)
}
 0xa02   : > { %s4214_s10 = scalar_lea.hbm %s5213_s14, 128  ;;  %s4218_s2 = scalar_lea.hbm %s5403_s25, 768 }
 0xa03   : > { %p4215_p13 = scmp.ne.s32.totalorder %s5213_s14, %s4214_s10  ;;  %p4219_p7 = scmp.lt.u32.totalorder %s5213_s14, %s5403_s25 }
 0xa04   : > { %p4220_p12 = scmp.lt.u32.totalorder %s4218_s2, %s4214_s10  ;;  %p4222_p9 = scmp.lt.u32.totalorder %s4214_s10, %s5213_s14 }
 0xa05   : > { %p4216_p11 = pnand %p4215_p13, %p5404_p4 }
 0xa06   : > { %p4221_p8 = por %p4220_p12, %p4219_p7 }
 0xa07   : > { %p4217_p0 = pneg %p4216_p11 }
 0xa08   : > { %p4223_p2 = por %p4222_p9, %p4221_p8 }
 0xa0a   : > { %p4224_p5 = pnand %p4223_p2, %p4217_p0 }
 0xa0c   : > { %4227 = shalt.err (!%p4224_p5)
}
 0xa0d   : > { %3638 = dma.vmem_to_hbm [thread:$0]  (%p5404_p4), %s5215_s21, 128, %s5213_s14, %s2931_s26  }
 0xa0e PF: > { %p3683_p1 = scmp.ge.s32.totalorder %s4342_s6, 2  ;;  %s2958_s23 = sand.u32 1, %s4314_s30  }
 0xa0f   : > { %p5405_p6 = scmp.ne.s32.totalorder %s5367_s17, 0  ;;  %s2959_s19 = scalar_lea.sflag [#allocation4], %s2958_s23 }
 0xa11   : > { %p3667_p10 = pnand %p3683_p1, %p5405_p6 }
 0xa13   : > { %4297 = dma.done.wait (!%p3667_p10), %s2959_s19, 128  }
 0xa14   : > { %4299 = vsyncadd (!%p3667_p10), %s2959_s19, 4294967168  ;;  %s44_s6 = sadd.s32 1, %s4342_s6   ;;  %s5406_s20 = sld [smem:[#allocation28_spill]] }
 0xa15   : > { %p41_p3 = scmp.ge.s32.totalorder %s44_s6, 8   ;;  %s5407_s21 = sld [smem:[#allocation29_spill]] }
 0xa16   : > { %s5408_s3 = smov %s4306_s28  ;;  %s5409_s28 = smov %s4310_s29 }
 0xa17   : > { %s5410_s29 = smov %s4746_s11  ;;  %s5411_s30 = smov %s4318_s4 }
 0xa18   : > { %s5412_s4 = smov %s4322_s0  ;;  %s5413_s0 = smov %s4749_s27 }
 0xa19   : > { %s5414_s23 = smov %s4334_s5  ;;  %s5415_s1 = smov %s4338_s24 }
 0xa1a   : > { %s5416_s5 = smov %s5406_s20  ;;  %43 = sbr.rel (!%p41_p3) target bundleno = 38 (0x26), region = 202 }
 0xa1b   : > { %s5417_s24 = smov %s5407_s21 }
 0xa21   :  { %2964 = vsyncpa [#allocation3], 1 }
 0xa22   :  { %2966 = vsyncpa [#allocation3 + $0x1], 1 }
 0xa23   :  { %2967 = vsyncpa [#allocation6], 1 }
 0xa24   :  { %2969 = vsyncpa [#allocation6 + $0x1], 1 }
 0xa25   :  { %2970 = vsyncpa [#allocation9], 1 }
 0xa26   :  { %2971 = vsyncpa [#allocation12], 1 }
 0xa27   :  { %2972 = vsyncpa [#allocation15], 1 }
 0xa28   :  { %2973 = vsyncpa [#allocation4], 1 }
 0xa29   :  { %2975 = vsyncpa [#allocation4 + $0x1], 1 }

</bundles_post_ra>
